<compile_context>
chip_gen: v7x
topology: tpu7x:2x2x1
jax: 0.10.0
libtpu: 0.0.40
codegen_flags: <defaults>
</compile_context>

<pallas_src>
import jax
import jax.numpy as jnp
from jax import lax
from jax.experimental import pallas as pl
from jax.experimental.pallas import tpu as pltpu


# -----------------------------------------------------------------------------
# Pallas kernel: fused dual-branch 4-layer MLP + sigmoid / softmax heads.
# -----------------------------------------------------------------------------
def _osg_decoder_kernel(x_ref, w0, b0, w1, b1, w2, b2, w3, b3, out_ref):
    # x_ref: (n_planes, TM, C) feature tile (f32). w*: fused weights (bf16/f32),
    # b*: fused biases (1, width) f32. out_ref: (TM, 8) = [sigma | rgb | sem].
    n_planes, _, C = x_ref.shape
    cdt = w0.dtype                                   # MXU operand dtype

    # Layer 0: sum over planes of (TM, C) @ (C, 2H)  ==  concat-features matmul.
    h = jnp.dot(x_ref[0].astype(cdt), w0[0:C, :],
                preferred_element_type=jnp.float32)
    for p in range(1, n_planes):
        h = h + jnp.dot(x_ref[p].astype(cdt), w0[p * C:(p + 1) * C, :],
                        preferred_element_type=jnp.float32)
    h = jnp.maximum(h + b0[...], 0.0)

    # Fused hidden layers (block-diagonal weights keep the two branches independent).
    h = jnp.maximum(
        jnp.dot(h.astype(cdt), w1[...], preferred_element_type=jnp.float32)
        + b1[...], 0.0)
    h = jnp.maximum(
        jnp.dot(h.astype(cdt), w2[...], preferred_element_type=jnp.float32)
        + b2[...], 0.0)
    out = (jnp.dot(h.astype(cdt), w3[...], preferred_element_type=jnp.float32)
           + b3[...])                                # (TM, 8) = [net(4) | sem(4)]

    # Heads computed full-width with a column mask (single unmasked 8-wide store).
    col = lax.broadcasted_iota(jnp.int32, out.shape, 1)           # (TM, 8)

    # rgb head: sigmoid(x) * (1 + 2*0.001) - 0.001   (kept only for cols 1..3)
    rgb_all = (1.0 / (1.0 + jnp.exp(-out))) * (1.0 + 2.0 * 0.001) - 0.001

    # semantic head: softmax over cols 4..7 (exp(-inf) == 0 for the other cols)
    logits = jnp.where(col >= 4, out, -jnp.inf)
    m = jnp.max(logits, axis=-1, keepdims=True)
    e = jnp.exp(logits - m)
    soft = e * pl.reciprocal(jnp.sum(e, axis=-1, keepdims=True), approx=True)

    out_ref[...] = jnp.where(col == 0, out,                        # sigma (raw)
                             jnp.where(col < 4, rgb_all, soft))


# -----------------------------------------------------------------------------
# Branch fusion: one concat (layer 0) + block-diagonal (layers 1..3) MLP.
# -----------------------------------------------------------------------------
def _block_diag(a, b):
    (r1, c1), (r2, c2) = a.shape, b.shape
    top = jnp.concatenate([a, jnp.zeros((r1, c2), a.dtype)], axis=1)
    bot = jnp.concatenate([jnp.zeros((r2, c1), b.dtype), b], axis=1)
    return jnp.concatenate([top, bot], axis=0)


def _fuse_params(params, mxu_dtype):
    net, sem = params["net"], params["semantic_net"]

    def bias2d(a, b):
        return jnp.concatenate([a, b]).reshape(1, -1).astype(jnp.float32)

    w0 = jnp.concatenate([net["w0"], sem["w0"]], axis=1).astype(mxu_dtype)  # (3C, 2H)
    w1 = _block_diag(net["w1"], sem["w1"]).astype(mxu_dtype)                # (2H, 2H)
    w2 = _block_diag(net["w2"], sem["w2"]).astype(mxu_dtype)                # (2H, 2H)
    w3 = _block_diag(net["w3"], sem["w3"]).astype(mxu_dtype)                # (2H, 8)
    return (w0, bias2d(net["b0"], sem["b0"]),
            w1, bias2d(net["b1"], sem["b1"]),
            w2, bias2d(net["b2"], sem["b2"]),
            w3, bias2d(net["b3"], sem["b3"]))


# -----------------------------------------------------------------------------
# Wrapper
# -----------------------------------------------------------------------------
def osg_decoder_forward(sampled_features, ray_directions, params, *,
                        tm=2048, mxu_dtype=jnp.bfloat16):
    """sampled_features: (N, n_planes, M, C); ray_directions unused (as in torch).

    tm: row-tile size (sweep 1024-4096; keep the grid >= 2 steps on v7x so both
        TensorCores get work).
    mxu_dtype: matmul-operand dtype (bf16 default; jnp.float32 for exact f32).
    """
    del ray_directions  # unused by the reference forward
    N, n_planes, M, C = sampled_features.shape

    fused_params = _fuse_params(params, mxu_dtype)

    # Largest row tile that fits, never exceeding M; multiple of 8 otherwise.
    tm_eff = M if M <= tm else max(8, (tm // 8) * 8)
    grid = (N, pl.cdiv(M, tm_eff))

    def const_spec(a):
        return pl.BlockSpec(a.shape, lambda n, i: (0, 0))

    in_specs = [pl.BlockSpec((None, n_planes, tm_eff, C),
                             lambda n, i: (n, 0, i, 0))]
    in_specs += [const_spec(p) for p in fused_params]

    fused_out = pl.pallas_call(
        _osg_decoder_kernel,
        out_shape=jax.ShapeDtypeStruct((N, M, 8), jnp.float32),
        grid_spec=pltpu.PrefetchScalarGridSpec(
            num_scalar_prefetch=0,
            grid=grid,
            in_specs=in_specs,
            out_specs=pl.BlockSpec((None, tm_eff, 8), lambda n, i: (n, i, 0)),
        ),
        compiler_params=pltpu.CompilerParams(
            dimension_semantics=("parallel", "parallel"),
        ),
    )(sampled_features, *fused_params)

    return {"rgb": fused_out[..., 1:4],
            "sigma": fused_out[..., 0:1],
            "semantic": fused_out[..., 4:8]}


# -----------------------------------------------------------------------------
# Deterministic parameter construction (matches OSGDecoder.__init__ shapes):
#   net:          Linear(3*C, H), Linear(H, H), Linear(H, H), Linear(H, 4)
#   semantic_net: Linear(3*C, H), Linear(H, H), Linear(H, H), Linear(H, 4)
#   (biases initialized to zeros, as in the module)
# -----------------------------------------------------------------------------
def make_params(key, n_features, hidden_dim=32, num_layers=4):
    assert num_layers == 4, "script specialized to num_layers=4 (module default)"
    cin = 3 * n_features
    dims = [(cin, hidden_dim), (hidden_dim, hidden_dim),
            (hidden_dim, hidden_dim), (hidden_dim, 4)]

    def make_branch(k):
        branch = {}
        for i, (din, dout) in enumerate(dims):
            k, sub = jax.random.split(k)
            branch[f"w{i}"] = (jax.random.normal(sub, (din, dout), jnp.float32)
                               * (1.0 / jnp.sqrt(din)))
            branch[f"b{i}"] = jnp.zeros((dout,), jnp.float32)
        return branch, k

    net, key = make_branch(key)
    sem_net, key = make_branch(key)
    return {"net": net, "semantic_net": sem_net}


# Pure-JAX reference mirroring the PyTorch forward. `mxu_dtype` lets the check
# use the same matmul-operand precision as the kernel (f32 accumulation always).
def reference_forward(sampled_features, params, mxu_dtype=jnp.float32):
    N, n_planes, M, C = sampled_features.shape
    x = jnp.transpose(sampled_features, (0, 2, 1, 3)).reshape(N * M, n_planes * C)

    def mlp(x, branch):
        h = x
        for i in range(4):
            h = jnp.dot(h.astype(mxu_dtype), branch[f"w{i}"].astype(mxu_dtype),
                        preferred_element_type=jnp.float32) + branch[f"b{i}"]
            if i < 3:
                h = jnp.maximum(h, 0.0)
        return h

    out = mlp(x, params["net"]).reshape(N, M, 4)
    sem = mlp(x, params["semantic_net"]).reshape(N, M, 4)
    rgb = (1.0 / (1.0 + jnp.exp(-out[..., 1:]))) * (1 + 2 * 0.001) - 0.001
    sigma = out[..., 0:1]
    m = jnp.max(sem, axis=-1, keepdims=True)
    e = jnp.exp(sem - m)
    semantic = e / jnp.sum(e, axis=-1, keepdims=True)
    return {"rgb": rgb, "sigma": sigma, "semantic": semantic}


if __name__ == "__main__":
    key = jax.random.PRNGKey(0)

    n_features = 4          # per-plane feature dim C
    hidden_dim = 32
    N, n_planes, M = 2, 3, 256

    kp, kf, kd = jax.random.split(key, 3)
    params = make_params(kp, n_features, hidden_dim=hidden_dim)

    sampled_features = jax.random.normal(kf, (N, n_planes, M, n_features), jnp.float32)
    ray_directions = jax.random.normal(kd, (N, M, 3), jnp.float32)

    out = osg_decoder_forward(sampled_features, ray_directions, params,
                              tm=2048, mxu_dtype=jnp.bfloat16)
    jax.block_until_ready(out)

    # Tight check vs. a reference that matches the kernel's matmul precision
    # (bf16 operands, f32 accumulation). The approx-reciprocal softmax adds up
    # to ~1e-3 to "semantic".
    ref = reference_forward(sampled_features, params, mxu_dtype=jnp.bfloat16)
    tol = {"rgb": 2e-3, "sigma": 2e-3, "semantic": 4e-3}
    for k in ("rgb", "sigma", "semantic"):
        assert out[k].shape == ref[k].shape, (k, out[k].shape, ref[k].shape)
        assert jnp.allclose(out[k], ref[k], atol=tol[k], rtol=tol[k]), k

    # Loose sanity check vs. the pure-f32 reference (PyTorch-equivalent math):
    # the only differences are bf16 operand rounding + the approx reciprocal.
    ref32 = reference_forward(sampled_features, params, mxu_dtype=jnp.float32)
    for k in ("rgb", "sigma", "semantic"):
        assert jnp.allclose(out[k], ref32[k], atol=5e-2, rtol=5e-2), k

    print("KERNEL_OK")
</pallas_src>

<mosaic_0001>
module attributes {stable_mosaic.version = 11 : i64} {
  func.func @_osg_decoder_kernel(%arg0: i32, %arg1: i32, %arg2: memref<1x3x256x4xf32, #tpu.memory_space<vmem>>, %arg3: memref<12x64xbf16, #tpu.memory_space<vmem>>, %arg4: memref<1x64xf32, #tpu.memory_space<vmem>>, %arg5: memref<64x64xbf16, #tpu.memory_space<vmem>>, %arg6: memref<1x64xf32, #tpu.memory_space<vmem>>, %arg7: memref<64x64xbf16, #tpu.memory_space<vmem>>, %arg8: memref<1x64xf32, #tpu.memory_space<vmem>>, %arg9: memref<64x8xbf16, #tpu.memory_space<vmem>>, %arg10: memref<1x8xf32, #tpu.memory_space<vmem>>, %arg11: memref<1x256x8xf32, #tpu.memory_space<vmem>>) attributes {dimension_semantics = [#tpu.dimension_semantics<parallel>, #tpu.dimension_semantics<parallel>], iteration_bounds = array<i64: 2, 1>, scalar_prefetch = 0 : i64, scratch_operands = 0 : i64, tpu.core_type = #tpu.core_type<tc>, window_params = [{transform_indices = @transform_0, window_bounds = array<i64: 1, 3, 256, 4>}, {pipeline_mode = #tpu.pipeline_mode<synchronous>, transform_indices = @transform_1, window_bounds = array<i64: 12, 64>}, {pipeline_mode = #tpu.pipeline_mode<synchronous>, transform_indices = @transform_2, window_bounds = array<i64: 1, 64>}, {pipeline_mode = #tpu.pipeline_mode<synchronous>, transform_indices = @transform_3, window_bounds = array<i64: 64, 64>}, {pipeline_mode = #tpu.pipeline_mode<synchronous>, transform_indices = @transform_4, window_bounds = array<i64: 1, 64>}, {pipeline_mode = #tpu.pipeline_mode<synchronous>, transform_indices = @transform_5, window_bounds = array<i64: 64, 64>}, {pipeline_mode = #tpu.pipeline_mode<synchronous>, transform_indices = @transform_6, window_bounds = array<i64: 1, 64>}, {pipeline_mode = #tpu.pipeline_mode<synchronous>, transform_indices = @transform_7, window_bounds = array<i64: 64, 8>}, {pipeline_mode = #tpu.pipeline_mode<synchronous>, transform_indices = @transform_8, window_bounds = array<i64: 1, 8>}, {transform_indices = @transform_9, window_bounds = array<i64: 1, 256, 8>}]} {
    %c0 = arith.constant 0 : index
    %c0_0 = arith.constant 0 : index
    %c0_1 = arith.constant 0 : index
    %c0_2 = arith.constant 0 : index
    %0 = vector.load %arg2[%c0, %c0_0, %c0_1, %c0_2] : memref<1x3x256x4xf32, #tpu.memory_space<vmem>>, vector<1x1x256x4xf32>
    %1 = vector.shape_cast %0 : vector<1x1x256x4xf32> to vector<256x4xf32>
    %2 = arith.truncf %1 : vector<256x4xf32> to vector<256x4xbf16>
    %c0_3 = arith.constant 0 : index
    %c0_4 = arith.constant 0 : index
    %3 = vector.load %arg3[%c0_3, %c0_4] : memref<12x64xbf16, #tpu.memory_space<vmem>>, vector<4x64xbf16>
    %cst = arith.constant dense<0.000000e+00> : vector<256x64xf32>
    %4 = tpu.matmul %2, %3, %cst {dimension_numbers = #tpu.dot_dimension_numbers<[1], [0], [0], [1], [0, 0, 1, 1], [], []>} : vector<256x4xbf16>, vector<4x64xbf16>, vector<256x64xf32> -> vector<256x64xf32>
    %c0_5 = arith.constant 0 : index
    %c1 = arith.constant 1 : index
    %c0_6 = arith.constant 0 : index
    %c0_7 = arith.constant 0 : index
    %5 = vector.load %arg2[%c0_5, %c1, %c0_6, %c0_7] : memref<1x3x256x4xf32, #tpu.memory_space<vmem>>, vector<1x1x256x4xf32>
    %6 = vector.shape_cast %5 : vector<1x1x256x4xf32> to vector<256x4xf32>
    %7 = arith.truncf %6 : vector<256x4xf32> to vector<256x4xbf16>
    %c4 = arith.constant 4 : index
    %c0_8 = arith.constant 0 : index
    %8 = vector.load %arg3[%c4, %c0_8] : memref<12x64xbf16, #tpu.memory_space<vmem>>, vector<4x64xbf16>
    %cst_9 = arith.constant dense<0.000000e+00> : vector<256x64xf32>
    %9 = tpu.matmul %7, %8, %cst_9 {dimension_numbers = #tpu.dot_dimension_numbers<[1], [0], [0], [1], [0, 0, 1, 1], [], []>} : vector<256x4xbf16>, vector<4x64xbf16>, vector<256x64xf32> -> vector<256x64xf32>
    %10 = arith.addf %4, %9 : vector<256x64xf32>
    %c0_10 = arith.constant 0 : index
    %c2 = arith.constant 2 : index
    %c0_11 = arith.constant 0 : index
    %c0_12 = arith.constant 0 : index
    %11 = vector.load %arg2[%c0_10, %c2, %c0_11, %c0_12] : memref<1x3x256x4xf32, #tpu.memory_space<vmem>>, vector<1x1x256x4xf32>
    %12 = vector.shape_cast %11 : vector<1x1x256x4xf32> to vector<256x4xf32>
    %13 = arith.truncf %12 : vector<256x4xf32> to vector<256x4xbf16>
    %c8 = arith.constant 8 : index
    %c0_13 = arith.constant 0 : index
    %14 = vector.load %arg3[%c8, %c0_13] : memref<12x64xbf16, #tpu.memory_space<vmem>>, vector<4x64xbf16>
    %cst_14 = arith.constant dense<0.000000e+00> : vector<256x64xf32>
    %15 = tpu.matmul %13, %14, %cst_14 {dimension_numbers = #tpu.dot_dimension_numbers<[1], [0], [0], [1], [0, 0, 1, 1], [], []>} : vector<256x4xbf16>, vector<4x64xbf16>, vector<256x64xf32> -> vector<256x64xf32>
    %16 = arith.addf %10, %15 : vector<256x64xf32>
    %c0_15 = arith.constant 0 : index
    %c0_16 = arith.constant 0 : index
    %17 = vector.load %arg4[%c0_15, %c0_16] : memref<1x64xf32, #tpu.memory_space<vmem>>, vector<1x64xf32>
    %18 = vector.broadcast %17 : vector<1x64xf32> to vector<256x64xf32>
    %19 = arith.addf %16, %18 : vector<256x64xf32>
    %cst_17 = arith.constant 0.000000e+00 : f32
    %20 = vector.broadcast %cst_17 : f32 to vector<256x64xf32>
    %21 = arith.maximumf %19, %20 : vector<256x64xf32>
    %22 = arith.truncf %21 : vector<256x64xf32> to vector<256x64xbf16>
    %c0_18 = arith.constant 0 : index
    %c0_19 = arith.constant 0 : index
    %23 = vector.load %arg5[%c0_18, %c0_19] : memref<64x64xbf16, #tpu.memory_space<vmem>>, vector<64x64xbf16>
    %cst_20 = arith.constant dense<0.000000e+00> : vector<256x64xf32>
    %24 = tpu.matmul %22, %23, %cst_20 {dimension_numbers = #tpu.dot_dimension_numbers<[1], [0], [0], [1], [0, 0, 1, 1], [], []>} : vector<256x64xbf16>, vector<64x64xbf16>, vector<256x64xf32> -> vector<256x64xf32>
    %c0_21 = arith.constant 0 : index
    %c0_22 = arith.constant 0 : index
    %25 = vector.load %arg6[%c0_21, %c0_22] : memref<1x64xf32, #tpu.memory_space<vmem>>, vector<1x64xf32>
    %26 = vector.broadcast %25 : vector<1x64xf32> to vector<256x64xf32>
    %27 = arith.addf %24, %26 : vector<256x64xf32>
    %cst_23 = arith.constant 0.000000e+00 : f32
    %28 = vector.broadcast %cst_23 : f32 to vector<256x64xf32>
    %29 = arith.maximumf %27, %28 : vector<256x64xf32>
    %30 = arith.truncf %29 : vector<256x64xf32> to vector<256x64xbf16>
    %c0_24 = arith.constant 0 : index
    %c0_25 = arith.constant 0 : index
    %31 = vector.load %arg7[%c0_24, %c0_25] : memref<64x64xbf16, #tpu.memory_space<vmem>>, vector<64x64xbf16>
    %cst_26 = arith.constant dense<0.000000e+00> : vector<256x64xf32>
    %32 = tpu.matmul %30, %31, %cst_26 {dimension_numbers = #tpu.dot_dimension_numbers<[1], [0], [0], [1], [0, 0, 1, 1], [], []>} : vector<256x64xbf16>, vector<64x64xbf16>, vector<256x64xf32> -> vector<256x64xf32>
    %c0_27 = arith.constant 0 : index
    %c0_28 = arith.constant 0 : index
    %33 = vector.load %arg8[%c0_27, %c0_28] : memref<1x64xf32, #tpu.memory_space<vmem>>, vector<1x64xf32>
    %34 = vector.broadcast %33 : vector<1x64xf32> to vector<256x64xf32>
    %35 = arith.addf %32, %34 : vector<256x64xf32>
    %cst_29 = arith.constant 0.000000e+00 : f32
    %36 = vector.broadcast %cst_29 : f32 to vector<256x64xf32>
    %37 = arith.maximumf %35, %36 : vector<256x64xf32>
    %38 = arith.truncf %37 : vector<256x64xf32> to vector<256x64xbf16>
    %c0_30 = arith.constant 0 : index
    %c0_31 = arith.constant 0 : index
    %39 = vector.load %arg9[%c0_30, %c0_31] : memref<64x8xbf16, #tpu.memory_space<vmem>>, vector<64x8xbf16>
    %cst_32 = arith.constant dense<0.000000e+00> : vector<256x8xf32>
    %40 = tpu.matmul %38, %39, %cst_32 {dimension_numbers = #tpu.dot_dimension_numbers<[1], [0], [0], [1], [0, 0, 1, 1], [], []>} : vector<256x64xbf16>, vector<64x8xbf16>, vector<256x8xf32> -> vector<256x8xf32>
    %c0_33 = arith.constant 0 : index
    %c0_34 = arith.constant 0 : index
    %41 = vector.load %arg10[%c0_33, %c0_34] : memref<1x8xf32, #tpu.memory_space<vmem>>, vector<1x8xf32>
    %42 = vector.broadcast %41 : vector<1x8xf32> to vector<256x8xf32>
    %43 = arith.addf %40, %42 : vector<256x8xf32>
    %44 = tpu.iota {dimensions = array<i32: 1>} : vector<256x8xi32>
    %cst_35 = arith.constant 0.000000e+00 : f32
    %45 = vector.broadcast %cst_35 : f32 to vector<256x8xf32>
    %46 = arith.subf %45, %43 : vector<256x8xf32>
    %47 = math.exp %46 : vector<256x8xf32>
    %cst_36 = arith.constant 1.000000e+00 : f32
    %48 = vector.broadcast %cst_36 : f32 to vector<256x8xf32>
    %49 = arith.addf %48, %47 : vector<256x8xf32>
    %cst_37 = arith.constant 1.000000e+00 : f32
    %50 = vector.broadcast %cst_37 : f32 to vector<256x8xf32>
    %51 = arith.divf %50, %49 : vector<256x8xf32>
    %cst_38 = arith.constant 1.002000e+00 : f32
    %52 = vector.broadcast %cst_38 : f32 to vector<256x8xf32>
    %53 = arith.mulf %51, %52 : vector<256x8xf32>
    %cst_39 = arith.constant 1.000000e-03 : f32
    %54 = vector.broadcast %cst_39 : f32 to vector<256x8xf32>
    %55 = arith.subf %53, %54 : vector<256x8xf32>
    %c4_i32 = arith.constant 4 : i32
    %56 = vector.broadcast %c4_i32 : i32 to vector<256x8xi32>
    %57 = arith.cmpi sge, %44, %56 : vector<256x8xi32>
    %cst_40 = arith.constant 0xFF800000 : f32
    %58 = vector.broadcast %cst_40 : f32 to vector<256x8xf32>
    %59 = arith.select %57, %43, %58 : vector<256x8xi1>, vector<256x8xf32>
    %cst_41 = arith.constant dense<0xFF800000> : vector<256xf32>
    %60 = vector.multi_reduction <maximumf>, %59, %cst_41 [1] : vector<256x8xf32> to vector<256xf32>
    %61 = vector.shape_cast %60 : vector<256xf32> to vector<256x1xf32>
    %62 = vector.broadcast %61 : vector<256x1xf32> to vector<256x8xf32>
    %63 = arith.subf %59, %62 : vector<256x8xf32>
    %64 = math.exp %63 : vector<256x8xf32>
    %cst_42 = arith.constant dense<0.000000e+00> : vector<256xf32>
    %65 = vector.multi_reduction <add>, %64, %cst_42 [1] : vector<256x8xf32> to vector<256xf32>
    %66 = vector.shape_cast %65 : vector<256xf32> to vector<256x1xf32>
    %67 = tpu.reciprocal %66 {approx = true} : vector<256x1xf32> -> vector<256x1xf32>
    %68 = vector.broadcast %67 : vector<256x1xf32> to vector<256x8xf32>
    %69 = arith.mulf %64, %68 : vector<256x8xf32>
    %c0_i32 = arith.constant 0 : i32
    %70 = vector.broadcast %c0_i32 : i32 to vector<256x8xi32>
    %71 = arith.cmpi eq, %44, %70 : vector<256x8xi32>
    %c4_i32_43 = arith.constant 4 : i32
    %72 = vector.broadcast %c4_i32_43 : i32 to vector<256x8xi32>
    %73 = arith.cmpi slt, %44, %72 : vector<256x8xi32>
    %74 = arith.select %73, %55, %69 : vector<256x8xi1>, vector<256x8xf32>
    %75 = arith.select %71, %43, %74 : vector<256x8xi1>, vector<256x8xf32>
    %c0_44 = arith.constant 0 : index
    %c0_45 = arith.constant 0 : index
    %c0_46 = arith.constant 0 : index
    %76 = vector.load %arg11[%c0_44, %c0_45, %c0_46] : memref<1x256x8xf32, #tpu.memory_space<vmem>>, vector<1x256x8xf32>
    %77 = vector.shape_cast %76 : vector<1x256x8xf32> to vector<256x8xf32>
    %78 = vector.shape_cast %75 : vector<256x8xf32> to vector<1x256x8xf32>
    tpu.vector_store %arg11[%c0_44, %c0_45, %c0_46], %78 {strides = array<i32>} : memref<1x256x8xf32, #tpu.memory_space<vmem>>, vector<1x256x8xf32>,
    return
  }
  func.func @transform_0(%arg0: i32, %arg1: i32) -> (i32, i32, i32, i32) {
    %c0_i32 = arith.constant 0 : i32
    %c0_i32_0 = arith.constant 0 : i32
    %c0_i32_1 = arith.constant 0 : i32
    return %arg0, %c0_i32, %arg1, %c0_i32_0 : i32, i32, i32, i32
  }
  func.func @transform_1(%arg0: i32, %arg1: i32) -> (i32, i32) {
    %c0_i32 = arith.constant 0 : i32
    %c0_i32_0 = arith.constant 0 : i32
    %c0_i32_1 = arith.constant 0 : i32
    return %c0_i32, %c0_i32_0 : i32, i32
  }
  func.func @transform_2(%arg0: i32, %arg1: i32) -> (i32, i32) {
    %c0_i32 = arith.constant 0 : i32
    %c0_i32_0 = arith.constant 0 : i32
    %c0_i32_1 = arith.constant 0 : i32
    return %c0_i32, %c0_i32_0 : i32, i32
  }
  func.func @transform_3(%arg0: i32, %arg1: i32) -> (i32, i32) {
    %c0_i32 = arith.constant 0 : i32
    %c0_i32_0 = arith.constant 0 : i32
    %c0_i32_1 = arith.constant 0 : i32
    return %c0_i32, %c0_i32_0 : i32, i32
  }
  func.func @transform_4(%arg0: i32, %arg1: i32) -> (i32, i32) {
    %c0_i32 = arith.constant 0 : i32
    %c0_i32_0 = arith.constant 0 : i32
    %c0_i32_1 = arith.constant 0 : i32
    return %c0_i32, %c0_i32_0 : i32, i32
  }
  func.func @transform_5(%arg0: i32, %arg1: i32) -> (i32, i32) {
    %c0_i32 = arith.constant 0 : i32
    %c0_i32_0 = arith.constant 0 : i32
    %c0_i32_1 = arith.constant 0 : i32
    return %c0_i32, %c0_i32_0 : i32, i32
  }
  func.func @transform_6(%arg0: i32, %arg1: i32) -> (i32, i32) {
    %c0_i32 = arith.constant 0 : i32
    %c0_i32_0 = arith.constant 0 : i32
    %c0_i32_1 = arith.constant 0 : i32
    return %c0_i32, %c0_i32_0 : i32, i32
  }
  func.func @transform_7(%arg0: i32, %arg1: i32) -> (i32, i32) {
    %c0_i32 = arith.constant 0 : i32
    %c0_i32_0 = arith.constant 0 : i32
    %c0_i32_1 = arith.constant 0 : i32
    return %c0_i32, %c0_i32_0 : i32, i32
  }
  func.func @transform_8(%arg0: i32, %arg1: i32) -> (i32, i32) {
    %c0_i32 = arith.constant 0 : i32
    %c0_i32_0 = arith.constant 0 : i32
    %c0_i32_1 = arith.constant 0 : i32
    return %c0_i32, %c0_i32_0 : i32, i32
  }
  func.func @transform_9(%arg0: i32, %arg1: i32) -> (i32, i32, i32) {
    %c0_i32 = arith.constant 0 : i32
    %c0_i32_0 = arith.constant 0 : i32
    return %arg0, %arg1, %c0_i32 : i32, i32, i32
  }
}

</mosaic_0001>

<bundles_post_ra>
// kernel: tpu_custom_call.1
= control target key start
LH: loop header
LB: loop body
LE: loop exit
PB: predicated region body
PF: predicated region fallthrough
CT: control target
= control target key end

     0   :  { %s3941_s30 = smov 0   ;;  %s3943_s10 = smov 0   ;;  %s5142_s0 = inlined_call_operand.vmem [shape: f32[2,3,256,4], index: 0, kind: input, shape index: {}]   ;;  %s5143_s1 = inlined_call_operand.vmem [shape: bf16[12,64], index: 1, kind: input, shape index: {}]   ;;  %s5144_s2 = inlined_call_operand.vmem [shape: f32[1,64], index: 2, kind: input, shape index: {}]   ;;  %s5145_s3 = inlined_call_operand.vmem [shape: bf16[64,64], index: 3, kind: input, shape index: {}]   ;;  %s5146_s4 = inlined_call_operand.vmem [shape: f32[1,64], index: 4, kind: input, shape index: {}]   ;;  %s5147_s5 = inlined_call_operand.vmem [shape: bf16[64,64], index: 5, kind: input, shape index: {}]   ;;  %s5148_s6 = inlined_call_operand.vmem [shape: f32[1,64], index: 6, kind: input, shape index: {}]   ;;  %s5149_s7 = inlined_call_operand.vmem [shape: bf16[64,8], index: 7, kind: input, shape index: {}]   ;;  %s5150_s8 = inlined_call_operand.vmem [shape: f32[1,8], index: 8, kind: input, shape index: {}]   ;;  %s5151_s9 = inlined_call_operand.vmem [shape: f32[2,256,8], index: 9, kind: output, shape index: {}]  }
   0x1   :  { %s3945_s11 = smov 0  }
   0x2 LB: > { %s31_s12 = sadd.s32 1, %s3885_s10  ;;  %p2957_p0 = scmp.ge.s32.totalorder %s3889_s11, 1  ;;  %s3889_s11 = sphi %s3945_s11, %s19_s11   ;;  %s3885_s10 = sphi %s3943_s10, %s5268_s10   ;;  %s3881_s30 = sphi %s3941_s30, %s5267_s30  }
   0x3   : > { %p33_p1 = scmp.ge.s32.totalorder %s31_s12, 2  ;;  %p308_p2 = scmp.lt.s32.totalorder %s3889_s11, 3 }
   0x5   : > { %s5270_s12 = smov (%p33_p1, %s31_s12), 0  ;;  %p309_p3 = pnand %p2957_p0, %p308_p2 }
   0x7   : > { %312 = sbr.rel (%p309_p3) target bundleno = 1421 (0x58d), region = 56 }
   0xe   : > { %v3598_v0 = vld [vmem:[%s5143_s1] ss:$0 sps:$4 sm:$0xcc]   ;;  %vm525_vm0 = vcmask 1041408   ;;  %p353_p4 = scmp.lt.s32.totalorder %s3881_s30, 1  ;;  %vm476_vm1 = vcmask 31744  }
   0xf   : > { %v475_v1 = vrot.slane %v3598_v0, 2  ;;  %v421_v2 = vld [vmem:[%s5143_s1] sm:$0x3]  ;;  %v3987_v14 = vld [vmem:[%s5143_s1 + $0x4] sm:$0x3]  ;;  %v3600_v58 = vld [vmem:[%s5145_s3 + $0x8] sm:$0xff]  }
  0x10   : > { %s5272_s30 = smov (!%p353_p4, %s3881_s30), 1  ;;  %v739_v12 = vsel %vm525_vm0, %v421_v2, 0  ;;  %v3599_v57 = vld [vmem:[%s5145_s3] sm:$0xff]   ;;  %vm1322_vm2 = vcmask 523264   ;;  %vm2415_vm4 = vcmask 64512  }
  0x11   : > { %3570 = vmatprep.subr.msk.bf16.mxu0 %vm525_vm0, %v475_v1  ;;  %v527_v3 = vsel %vm525_vm0, %v475_v1, 0  ;;  %s3573_s17 = smul.u32 768, %s5272_s30  ;;  %3386 = vmatprep.subr.bf16.mxu1 %v3599_v57  ;;  %v1001_v1 = vsel %vm525_vm0, %v3987_v14, 0  ;;  %s3172_s21 = sshll.u32 %s5272_s30, 8 }
  0x12   : > { %3285 = vmatpush3.bf16.msra.mxu0 %v527_v3  ;;  %3387 = vmatpush3.bf16.msra.mxu1 %v3599_v57  ;;  %s4848_s23 = scalar_lea.vmem %s5151_s9, %s3172_s21 }
  0x13   : > { %3571 = vmatprep.subr.msk.bf16.mxu0 %vm525_vm0, %v421_v2  ;;  %s3974_s20 = scalar_lea.vmem %s5142_s0, %s3573_s17  ;;  %3388 = vmatprep.subr.bf16.mxu1 %v3600_v58 }
  0x14   : > { %v2961_v4 = vld [vmem:[%s3974_s20 + $0x100] sm:$0xff]  ;;  %v2962_v5 = vld [vmem:[%s3974_s20 + $0x108] sm:$0xff]  ;;  %v2963_v6 = vld [vmem:[%s3974_s20 + $0x110] sm:$0xff] }
  0x15   : > { %v455_v7 = vpack.c.bf16 %v2962_v5, %v2961_v4  ;;  %v2964_v8 = vld [vmem:[%s3974_s20 + $0x118] sm:$0xff]  ;;  %v2965_v9 = vld [vmem:[%s3974_s20 + $0x120] sm:$0xff]  ;;  %v2966_v10 = vld [vmem:[%s3974_s20 + $0x128] sm:$0xff] }
  0x16   : > { %v456_v11 = vpack.c.bf16 %v2964_v8, %v2963_v6  ;;  %v457_v13 = vpack.c.bf16 %v2966_v10, %v2965_v9  ;;  %v2967_v15 = vld [vmem:[%s3974_s20 + $0x130] sm:$0xff]  ;;  %v2968_v16 = vld [vmem:[%s3974_s20 + $0x138] sm:$0xff]  ;;  %v2969_v17 = vld [vmem:[%s3974_s20 + $0x140] sm:$0xff]  ;;  %3389 = vmatpush3.bf16.msra.mxu1 %v3600_v58 }
  0x17   : > { %3286 = vmatprep.mubr.msk.bf16.mxu0 %vm476_vm1, %v455_v7  ;;  %v2970_v18 = vld [vmem:[%s3974_s20 + $0x148] sm:$0xff]  ;;  %v458_v19 = vpack.c.bf16 %v2968_v16, %v2967_v15  ;;  %v2971_v21 = vld [vmem:[%s3974_s20 + $0x150] sm:$0xff]  ;;  %v2972_v22 = vld [vmem:[%s3974_s20 + $0x158] sm:$0xff] }
  0x18   : > { %3287 = vmatmul.mubr.msk.bf16.vlgmr.msra.gmra.mrb[0].mxu0 %vm476_vm1, %v456_v11  ;;  %v459_v20 = vpack.c.bf16 %v2970_v18, %v2969_v17  ;;  %v2973_v23 = vld [vmem:[%s3974_s20 + $0x160] sm:$0xff]  ;;  %v2974_v24 = vld [vmem:[%s3974_s20 + $0x168] sm:$0xff]  ;;  %v460_v25 = vpack.c.bf16 %v2972_v22, %v2971_v21  ;;  %v2975_v27 = vld [vmem:[%s3974_s20 + $0x170] sm:$0xff] }
  0x19   : > { %3319 = vmatpush3.bf16.msra.mxu0 %v739_v12  ;;  %3290 = vmatprep.mubr.msk.bf16.mxu0 %vm476_vm1, %v457_v13  ;;  %v461_v26 = vpack.c.bf16 %v2974_v24, %v2973_v23  ;;  %v2976_v28 = vld [vmem:[%s3974_s20 + $0x178] sm:$0xff]  ;;  %v2977_v29 = vld [vmem:[%s3974_s20 + $0x180] sm:$0xff]  ;;  %v2978_v30 = vld [vmem:[%s3974_s20 + $0x188] sm:$0xff] }
  0x1a   : > { %3572 = vmatprep.subr.msk.bf16.mxu0 %vm525_vm0, %v3987_v14  ;;  %v462_v31 = vpack.c.bf16 %v2976_v28, %v2975_v27  ;;  %v463_v32 = vpack.c.bf16 %v2978_v30, %v2977_v29  ;;  %v2979_v33 = vld [vmem:[%s3974_s20 + $0x190] sm:$0xff]  ;;  %v2980_v34 = vld [vmem:[%s3974_s20 + $0x198] sm:$0xff]  ;;  %v2981_v35 = vld [vmem:[%s3974_s20 + $0x1a0] sm:$0xff] }
  0x1b   : > { %v2982_v36 = vld [vmem:[%s3974_s20 + $0x1a8] sm:$0xff]  ;;  %v464_v37 = vpack.c.bf16 %v2980_v34, %v2979_v33  ;;  %v2983_v39 = vld [vmem:[%s3974_s20 + $0x1b0] sm:$0xff]  ;;  %v2984_v40 = vld [vmem:[%s3974_s20 + $0x1b8] sm:$0xff] }
  0x1c   : > { %v465_v38 = vpack.c.bf16 %v2982_v36, %v2981_v35  ;;  %v2985_v41 = vld [vmem:[%s3974_s20 + $0x1c0] sm:$0xff]  ;;  %v2986_v42 = vld [vmem:[%s3974_s20 + $0x1c8] sm:$0xff]  ;;  %v466_v43 = vpack.c.bf16 %v2984_v40, %v2983_v39  ;;  %v2987_v45 = vld [vmem:[%s3974_s20 + $0x1d0] sm:$0xff] }
  0x1d   : > { %v467_v44 = vpack.c.bf16 %v2986_v42, %v2985_v41  ;;  %v2988_v46 = vld [vmem:[%s3974_s20 + $0x1d8] sm:$0xff]  ;;  %v2989_v47 = vld [vmem:[%s3974_s20 + $0x1e0] sm:$0xff]  ;;  %v2990_v48 = vld [vmem:[%s3974_s20 + $0x1e8] sm:$0xff] }
  0x1e   : > { %v468_v49 = vpack.c.bf16 %v2988_v46, %v2987_v45  ;;  %v469_v50 = vpack.c.bf16 %v2990_v48, %v2989_v47  ;;  %v2991_v51 = vld [vmem:[%s3974_s20 + $0x1f0] sm:$0xff]  ;;  %v2992_v52 = vld [vmem:[%s3974_s20 + $0x1f8] sm:$0xff]  ;;  %v373_v53 = vld [vmem:[%s3974_s20] sm:$0xff] }
  0x1f   : > { %v374_v54 = vld [vmem:[%s3974_s20 + $0x8] sm:$0xff]  ;;  %v470_v55 = vpack.c.bf16 %v2992_v52, %v2991_v51  ;;  %v375_v59 = vld [vmem:[%s3974_s20 + $0x10] sm:$0xff]  ;;  %v376_v60 = vld [vmem:[%s3974_s20 + $0x18] sm:$0xff] }
  0x20   : > { %3291 = vmatmul.mubr.msk.bf16.gmra.mrb[4].mxu0 %vm476_vm1, %v458_v19  ;;  %v405_v56 = vpack.c.bf16 %v374_v54, %v373_v53  ;;  %v377_v61 = vld [vmem:[%s3974_s20 + $0x20] sm:$0xff]  ;;  %v378_v62 = vld [vmem:[%s3974_s20 + $0x28] sm:$0xff]  ;;  %v406_v63 = vpack.c.bf16 %v376_v60, %v375_v59  ;;  %v379_v2 = vld [vmem:[%s3974_s20 + $0x30] sm:$0xff] }
  0x21   : > { %3294 = vmatprep.mubr.msk.bf16.mxu0 %vm476_vm1, %v459_v20  ;;  %v407_v0 = vpack.c.bf16 %v378_v62, %v377_v61  ;;  %v380_v3 = vld [vmem:[%s3974_s20 + $0x38] sm:$0xff]  ;;  %v381_v4 = vld [vmem:[%s3974_s20 + $0x40] sm:$0xff]  ;;  %v382_v5 = vld [vmem:[%s3974_s20 + $0x48] sm:$0xff] }
  0x22   : > { %v408_v6 = vpack.c.bf16 %v380_v3, %v379_v2  ;;  %v409_v7 = vpack.c.bf16 %v382_v5, %v381_v4  ;;  %v383_v8 = vld [vmem:[%s3974_s20 + $0x50] sm:$0xff]  ;;  %v384_v9 = vld [vmem:[%s3974_s20 + $0x58] sm:$0xff]  ;;  %v385_v10 = vld [vmem:[%s3974_s20 + $0x60] sm:$0xff] }
  0x23   : > { %v386_v11 = vld [vmem:[%s3974_s20 + $0x68] sm:$0xff]  ;;  %v410_v12 = vpack.c.bf16 %v384_v9, %v383_v8  ;;  %v387_v14 = vld [vmem:[%s3974_s20 + $0x70] sm:$0xff]  ;;  %v388_v15 = vld [vmem:[%s3974_s20 + $0x78] sm:$0xff] }
  0x24   : > { %v411_v13 = vpack.c.bf16 %v386_v11, %v385_v10  ;;  %v389_v16 = vld [vmem:[%s3974_s20 + $0x80] sm:$0xff]  ;;  %v390_v17 = vld [vmem:[%s3974_s20 + $0x88] sm:$0xff]  ;;  %v412_v18 = vpack.c.bf16 %v388_v15, %v387_v14  ;;  %v391_v20 = vld [vmem:[%s3974_s20 + $0x90] sm:$0xff] }
  0x25   : > { %v413_v19 = vpack.c.bf16 %v390_v17, %v389_v16  ;;  %v392_v21 = vld [vmem:[%s3974_s20 + $0x98] sm:$0xff]  ;;  %v393_v22 = vld [vmem:[%s3974_s20 + $0xa0] sm:$0xff]  ;;  %v394_v23 = vld [vmem:[%s3974_s20 + $0xa8] sm:$0xff] }
  0x26   : > { %v414_v24 = vpack.c.bf16 %v392_v21, %v391_v20  ;;  %v396_v27 = vld [vmem:[%s3974_s20 + $0xb8] sm:$0xff]  ;;  %v397_v28 = vld [vmem:[%s3974_s20 + $0xc0] sm:$0xff]  ;;  %v398_v29 = vld [vmem:[%s3974_s20 + $0xc8] sm:$0xff] }
  0x27   : > { %v400_v33 = vld [vmem:[%s3974_s20 + $0xd8] sm:$0xff]  ;;  %v401_v34 = vld [vmem:[%s3974_s20 + $0xe0] sm:$0xff]  ;;  %v402_v35 = vld [vmem:[%s3974_s20 + $0xe8] sm:$0xff] }
  0x28   : > { %3295 = vmatmul.mubr.msk.bf16.gmra.mrb[8].mxu0 %vm476_vm1, %v460_v25  ;;  %v415_v25 = vpack.c.bf16 %v394_v23, %v393_v22  ;;  %v404_v39 = vld [vmem:[%s3974_s20 + $0xf8] sm:$0xff]  ;;  %v3026_v40 = vld [vmem:[%s3974_s20 + $0x200] sm:$0xff]  ;;  %v3027_v41 = vld [vmem:[%s3974_s20 + $0x208] sm:$0xff] }
  0x29   : > { %3298 = vmatprep.mubr.msk.bf16.mxu0 %vm476_vm1, %v461_v26  ;;  %v395_v26 = vld [vmem:[%s3974_s20 + $0xb0] sm:$0xff]  ;;  %v3029_v45 = vld [vmem:[%s3974_s20 + $0x218] sm:$0xff]  ;;  %v3030_v46 = vld [vmem:[%s3974_s20 + $0x220] sm:$0xff] }
  0x2a   : > { %v416_v30 = vpack.c.bf16 %v396_v27, %v395_v26  ;;  %v3031_v47 = vld [vmem:[%s3974_s20 + $0x228] sm:$0xff]  ;;  %v3033_v51 = vld [vmem:[%s3974_s20 + $0x238] sm:$0xff]  ;;  %v3034_v52 = vld [vmem:[%s3974_s20 + $0x240] sm:$0xff] }
  0x2b   : > { %v3035_v53 = vld [vmem:[%s3974_s20 + $0x248] sm:$0xff]  ;;  %v3037_v57 = vld [vmem:[%s3974_s20 + $0x258] sm:$0xff]  ;;  %v3038_v58 = vld [vmem:[%s3974_s20 + $0x260] sm:$0xff] }
  0x2c   : > { %v3039_v59 = vld [vmem:[%s3974_s20 + $0x268] sm:$0xff]  ;;  %v3040_v62 = vld [vmem:[%s3974_s20 + $0x270] sm:$0xff]  ;;  %v3045_v5 = vld [vmem:[%s3974_s20 + $0x298] sm:$0xff] }
  0x2d   : > { %v941_v61 = vpack.c.bf16 %v3039_v59, %v3038_v58  ;;  %v3044_v4 = vld [vmem:[%s3974_s20 + $0x290] sm:$0xff]  ;;  %v3049_v11 = vld [vmem:[%s3974_s20 + $0x2b8] sm:$0xff]  ;;  %v3603_v27 = vld [vmem:[%s5147_s5] sm:$0xff]  }
  0x2e   : > { %v944_v8 = vpack.c.bf16 %v3045_v5, %v3044_v4  ;;  %v3048_v10 = vld [vmem:[%s3974_s20 + $0x2b0] sm:$0xff]  ;;  %v3053_v17 = vld [vmem:[%s3974_s20 + $0x2d8] sm:$0xff] }
  0x2f   : > { %v946_v14 = vpack.c.bf16 %v3049_v11, %v3048_v10  ;;  %v3052_v16 = vld [vmem:[%s3974_s20 + $0x2d0] sm:$0xff]  ;;  %v3057_v23 = vld [vmem:[%s3974_s20 + $0x2f8] sm:$0xff] }
  0x30   : > { %3299 = vmatmul.mubr.msk.bf16.gmra.mrb[12].mxu0 %vm476_vm1, %v462_v31  ;;  %v417_v31 = vpack.c.bf16 %v398_v29, %v397_v28  ;;  %v948_v20 = vpack.c.bf16 %v3053_v17, %v3052_v16  ;;  %v3056_v22 = vld [vmem:[%s3974_s20 + $0x2f0] sm:$0xff]  ;;  %v3602_v26 = vld [vmem:[%s5145_s3 + $0x18] sm:$0xff]   ;;  %v4148_v28 = vld [vmem:[%s5144_s2] ss:$0 sm:$0xff] }
  0x31   : > { %3302 = vmatprep.mubr.msk.bf16.mxu0 %vm476_vm1, %v463_v32  ;;  %v399_v32 = vld [vmem:[%s3974_s20 + $0xd0] sm:$0xff] }
  0x32   : > { %v418_v36 = vpack.c.bf16 %v400_v33, %v399_v32 }
  0x38   : > { %3303 = vmatmul.mubr.msk.bf16.gmra.mrb[16].mxu0 %vm476_vm1, %v464_v37  ;;  %v419_v37 = vpack.c.bf16 %v402_v35, %v401_v34 }
  0x39   : > { %3306 = vmatprep.mubr.msk.bf16.mxu0 %vm476_vm1, %v465_v38  ;;  %v403_v38 = vld [vmem:[%s3974_s20 + $0xf0] sm:$0xff] }
  0x3a   : > { %v420_v42 = vpack.c.bf16 %v404_v39, %v403_v38 }
  0x40   : > { %3307 = vmatmul.mubr.msk.bf16.gmra.mrb[20].mxu0 %vm476_vm1, %v466_v43  ;;  %v935_v43 = vpack.c.bf16 %v3027_v41, %v3026_v40 }
  0x41   : > { %3310 = vmatprep.mubr.msk.bf16.mxu0 %vm476_vm1, %v467_v44  ;;  %v3028_v44 = vld [vmem:[%s3974_s20 + $0x210] sm:$0xff] }
  0x42   : > { %v936_v48 = vpack.c.bf16 %v3029_v45, %v3028_v44 }
  0x48   : > { %3311 = vmatmul.mubr.msk.bf16.gmra.mrb[24].mxu0 %vm476_vm1, %v468_v49  ;;  %v937_v49 = vpack.c.bf16 %v3031_v47, %v3030_v46  ;;  %v3604_v46 = vld [vmem:[%s5147_s5 + $0x8] sm:$0xff]  }
  0x49   : > { %3314 = vmatprep.mubr.msk.bf16.mxu0 %vm476_vm1, %v469_v50  ;;  %v3032_v50 = vld [vmem:[%s3974_s20 + $0x230] sm:$0xff] }
  0x4a   : > { %v938_v54 = vpack.c.bf16 %v3033_v51, %v3032_v50 }
  0x50   : > { %3315 = vmatmul.mubr.msk.bf16.gmra.mrb[28].mxu0 %vm476_vm1, %v470_v55  ;;  %v939_v55 = vpack.c.bf16 %v3035_v53, %v3034_v52 }
  0x51   : > { %3320 = vmatprep.mubr.msk.bf16.mxu0 %vm476_vm1, %v405_v56  ;;  %v3036_v56 = vld [vmem:[%s3974_s20 + $0x250] sm:$0xff] }
  0x52   : > { %v940_v60 = vpack.c.bf16 %v3037_v57, %v3036_v56 }
  0x58   : > { %3321 = vmatmul.mubr.msk.bf16.vlgmr.msra.gmra.mrb[0].mxu0 %vm476_vm1, %v406_v63  ;;  %v3041_v63 = vld [vmem:[%s3974_s20 + $0x278] sm:$0xff] }
  0x59   : > { %3353 = vmatpush3.bf16.msra.mxu0 %v1001_v1  ;;  %3324 = vmatprep.mubr.msk.bf16.mxu0 %vm476_vm1, %v407_v0  ;;  %v3042_v0 = vld [vmem:[%s3974_s20 + $0x280] sm:$0xff]  ;;  %v3043_v1 = vld [vmem:[%s3974_s20 + $0x288] sm:$0xff]  ;;  %v942_v2 = vpack.c.bf16 %v3041_v63, %v3040_v62  ;;  %v3606_v62 = vld [vmem:[%s5147_s5 + $0x18] sm:$0xff]  }
  0x5a   : > { %v943_v3 = vpack.c.bf16 %v3043_v1, %v3042_v0 }
  0x60   : > { %3325 = vmatmul.mubr.msk.bf16.gmra.mrb[4].mxu0 %vm476_vm1, %v408_v6  ;;  %v3046_v6 = vld [vmem:[%s3974_s20 + $0x2a0] sm:$0xff] }
  0x61   : > { %3328 = vmatprep.mubr.msk.bf16.mxu0 %vm476_vm1, %v409_v7  ;;  %v3047_v7 = vld [vmem:[%s3974_s20 + $0x2a8] sm:$0xff] }
  0x62   : > { %v945_v9 = vpack.c.bf16 %v3047_v7, %v3046_v6 }
  0x68   : > { %3329 = vmatmul.mubr.msk.bf16.gmra.mrb[8].mxu0 %vm476_vm1, %v410_v12  ;;  %v3050_v12 = vld [vmem:[%s3974_s20 + $0x2c0] sm:$0xff] }
  0x69   : > { %3332 = vmatprep.mubr.msk.bf16.mxu0 %vm476_vm1, %v411_v13  ;;  %v3051_v13 = vld [vmem:[%s3974_s20 + $0x2c8] sm:$0xff] }
  0x6a   : > { %v947_v15 = vpack.c.bf16 %v3051_v13, %v3050_v12 }
  0x70   : > { %3333 = vmatmul.mubr.msk.bf16.gmra.mrb[12].mxu0 %vm476_vm1, %v412_v18  ;;  %v3054_v18 = vld [vmem:[%s3974_s20 + $0x2e0] sm:$0xff] }
  0x71   : > { %3336 = vmatprep.mubr.msk.bf16.mxu0 %vm476_vm1, %v413_v19  ;;  %v3055_v19 = vld [vmem:[%s3974_s20 + $0x2e8] sm:$0xff] }
  0x72   : > { %v949_v21 = vpack.c.bf16 %v3055_v19, %v3054_v18 }
  0x78   : > { %3337 = vmatmul.mubr.msk.bf16.gmra.mrb[16].mxu0 %vm476_vm1, %v414_v24  ;;  %v950_v24 = vpack.c.bf16 %v3057_v23, %v3056_v22 }
  0x79   : > { %3340 = vmatprep.mubr.msk.bf16.mxu0 %vm476_vm1, %v415_v25  ;;  %v3601_v25 = vld [vmem:[%s5145_s3 + $0x10] sm:$0xff]  }
  0x7a   : > { %3390 = vmatprep.subr.bf16.mxu1 %v3601_v25 }
  0x7b   : > { %3391 = vmatpush3.bf16.msra.mxu1 %v3601_v25 }
  0x7c   : > { %3392 = vmatprep.subr.bf16.mxu1 %v3602_v26 }
  0x7f   : > { %3393 = vmatpush3.bf16.msra.mxu1 %v3602_v26 }
  0x80   : > { %3341 = vmatmul.mubr.msk.bf16.gmra.mrb[20].mxu0 %vm476_vm1, %v416_v30  ;;  %3426 = vmatprep.subr.bf16.mxu1 %v3603_v27 }
  0x81   : > { %3344 = vmatprep.mubr.msk.bf16.mxu0 %vm476_vm1, %v417_v31 }
  0x88   : > { %3345 = vmatmul.mubr.msk.bf16.gmra.mrb[24].mxu0 %vm476_vm1, %v418_v36 }
  0x89   : > { %3348 = vmatprep.mubr.msk.bf16.mxu0 %vm476_vm1, %v419_v37 }
  0x90   : > { %3349 = vmatmul.mubr.msk.bf16.gmra.mrb[28].mxu0 %vm476_vm1, %v420_v42 }
  0x91   : > { %3354 = vmatprep.mubr.msk.bf16.mxu0 %vm476_vm1, %v935_v43 }
  0x98   : > { %3355 = vmatmul.mubr.msk.bf16.vlgmr.msra.gmra.mrb[0].mxu0 %vm476_vm1, %v936_v48 }
  0x99   : > { %3358 = vmatprep.mubr.msk.bf16.mxu0 %vm476_vm1, %v937_v49 }
  0xa0   : > { %3359 = vmatmul.mubr.msk.bf16.gmra.mrb[4].mxu0 %vm476_vm1, %v938_v54  ;;  %v3605_v54 = vld [vmem:[%s5147_s5 + $0x10] sm:$0xff]  }
  0xa1   : > { %3362 = vmatprep.mubr.msk.bf16.mxu0 %vm476_vm1, %v939_v55 }
  0xa8   : > { %3363 = vmatmul.mubr.msk.bf16.gmra.mrb[8].mxu0 %vm476_vm1, %v940_v60 }
  0xa9   : > { %3366 = vmatprep.mubr.msk.bf16.mxu0 %vm476_vm1, %v941_v61 }
  0xb0   : > { %3367 = vmatmul.mubr.msk.bf16.gmra.mrb[12].mxu0 %vm476_vm1, %v942_v2 }
  0xb1   : > { %3370 = vmatprep.mubr.msk.bf16.mxu0 %vm476_vm1, %v943_v3 }
  0xb8   : > { %3371 = vmatmul.mubr.msk.bf16.gmra.mrb[16].mxu0 %vm476_vm1, %v944_v8 }
  0xb9   : > { %3374 = vmatprep.mubr.msk.bf16.mxu0 %vm476_vm1, %v945_v9 }
  0xc0   : > { %3375 = vmatmul.mubr.msk.bf16.gmra.mrb[20].mxu0 %vm476_vm1, %v946_v14 }
  0xc1   : > { %3378 = vmatprep.mubr.msk.bf16.mxu0 %vm476_vm1, %v947_v15 }
  0xc8   : > { %3379 = vmatmul.mubr.msk.bf16.gmra.mrb[24].mxu0 %vm476_vm1, %v948_v20 }
  0xc9   : > { %3382 = vmatprep.mubr.msk.bf16.mxu0 %vm476_vm1, %v949_v21 }
  0xd0   : > { %3383 = vmatmul.mubr.msk.bf16.gmra.mrb[28].mxu0 %vm476_vm1, %v950_v24 }
 0x16b   : > { %v3356_v29 = vpop.f32.mrb[0].mxu0 }
 0x16c   : > { %v1205_v30 = vadd.f32 %v3356_v29, %v4148_v28  ;;  %v1037_v31 = vpop.f32.mrb[1].mxu0 }
 0x16d   : > { %v1203_v32 = vadd.f32 %v4148_v28, %v1037_v31  ;;  %v3357_v33 = vpop.f32.mrb[2].mxu0 }
 0x16e   : > { %v1206_v34 = vadd.f32 %v3357_v33, %v4148_v28  ;;  %v1040_v35 = vpop.f32.mrb[3].mxu0  ;;  %v1237_v37 = vmax.f32 %v1205_v30, 0.0 }
 0x16f   : > { %v1204_v36 = vadd.f32 %v4148_v28, %v1040_v35  ;;  %v1235_v39 = vmax.f32 %v1203_v32, 0.0 }
 0x170   : > { %v1238_v38 = vmax.f32 %v1206_v34, 0.0 }
 0x171   : > { %v1236_v40 = vmax.f32 %v1204_v36, 0.0 }
 0x172   : > { %v1268_v41 = vpack.c.bf16 %v1238_v38, %v1237_v37 }
 0x173   : > { %v3360_v42 = vpop.f32.mrb[4].mxu0  ;;  %v1267_v43 = vpack.c.bf16 %v1236_v40, %v1235_v39 }
 0x174   : > { %v1209_v44 = vadd.f32 %v3360_v42, %v4148_v28  ;;  %v1053_v45 = vpop.f32.mrb[5].mxu0 }
 0x175   : > { %v1207_v47 = vadd.f32 %v4148_v28, %v1053_v45  ;;  %v3361_v48 = vpop.f32.mrb[6].mxu0  ;;  %3394 = vmatprep.mubr.msk.bf16.mxu1 %vm1322_vm2, %v1267_v43 }
 0x176   : > { %v1210_v49 = vadd.f32 %v3361_v48, %v4148_v28  ;;  %v1056_v50 = vpop.f32.mrb[7].mxu0  ;;  %3395 = vmatmul.mubr.msk.bf16.vlgmr.msra.gmra.mrb[0].mxu1 %vm1322_vm2, %v1268_v41  ;;  %v1241_v52 = vmax.f32 %v1209_v44, 0.0 }
 0x177   : > { %v1208_v51 = vadd.f32 %v4148_v28, %v1056_v50  ;;  %3427 = vmatpush3.bf16.msra.mxu1 %v3603_v27  ;;  %v1239_v55 = vmax.f32 %v1207_v47, 0.0 }
 0x178   : > { %v1242_v53 = vmax.f32 %v1210_v49, 0.0  ;;  %3428 = vmatprep.subr.bf16.mxu1 %v3604_v46 }
 0x179   : > { %v1240_v56 = vmax.f32 %v1208_v51, 0.0 }
 0x17a   : > { %v1270_v57 = vpack.c.bf16 %v1242_v53, %v1241_v52 }
 0x17b   : > { %v1269_v58 = vpack.c.bf16 %v1240_v56, %v1239_v55  ;;  %v3364_v59 = vpop.f32.mrb[8].mxu0  ;;  %3429 = vmatpush3.bf16.msra.mxu1 %v3604_v46 }
 0x17c   : > { %v1213_v60 = vadd.f32 %v3364_v59, %v4148_v28  ;;  %v1069_v61 = vpop.f32.mrb[9].mxu0  ;;  %3430 = vmatprep.subr.bf16.mxu1 %v3605_v54 }
 0x17d   : > { %v1211_v63 = vadd.f32 %v4148_v28, %v1069_v61  ;;  %v3365_v0 = vpop.f32.mrb[10].mxu0  ;;  %3398 = vmatprep.mubr.msk.bf16.mxu1 %vm1322_vm2, %v1269_v58 }
 0x17e   : > { %v1214_v1 = vadd.f32 %v3365_v0, %v4148_v28  ;;  %v1072_v2 = vpop.f32.mrb[11].mxu0  ;;  %3399 = vmatmul.mubr.msk.bf16.gmra.mrb[4].mxu1 %vm1322_vm2, %v1270_v57  ;;  %v1245_v4 = vmax.f32 %v1213_v60, 0.0 }
 0x17f   : > { %v1212_v3 = vadd.f32 %v4148_v28, %v1072_v2  ;;  %3431 = vmatpush3.bf16.msra.mxu1 %v3605_v54  ;;  %v1243_v6 = vmax.f32 %v1211_v63, 0.0 }
 0x180   : > { %v1246_v5 = vmax.f32 %v1214_v1, 0.0  ;;  %3432 = vmatprep.subr.bf16.mxu1 %v3606_v62 }
 0x181   : > { %v1244_v7 = vmax.f32 %v1212_v3, 0.0 }
 0x182   : > { %v1272_v8 = vpack.c.bf16 %v1246_v5, %v1245_v4 }
 0x183   : > { %v1271_v9 = vpack.c.bf16 %v1244_v7, %v1243_v6  ;;  %v3368_v10 = vpop.f32.mrb[12].mxu0  ;;  %3433 = vmatpush3.bf16.msra.mxu1 %v3606_v62 }
 0x184   : > { %v1217_v11 = vadd.f32 %v3368_v10, %v4148_v28  ;;  %v1085_v12 = vpop.f32.mrb[13].mxu0 }
 0x185   : > { %v1215_v13 = vadd.f32 %v4148_v28, %v1085_v12  ;;  %v3369_v14 = vpop.f32.mrb[14].mxu0  ;;  %3402 = vmatprep.mubr.msk.bf16.mxu1 %vm1322_vm2, %v1271_v9 }
 0x186   : > { %v1218_v15 = vadd.f32 %v3369_v14, %v4148_v28  ;;  %v1088_v16 = vpop.f32.mrb[15].mxu0  ;;  %3403 = vmatmul.mubr.msk.bf16.gmra.mrb[8].mxu1 %vm1322_vm2, %v1272_v8  ;;  %v1249_v18 = vmax.f32 %v1217_v11, 0.0 }
 0x187   : > { %v1216_v17 = vadd.f32 %v4148_v28, %v1088_v16  ;;  %v1247_v20 = vmax.f32 %v1215_v13, 0.0 }
 0x188   : > { %v1250_v19 = vmax.f32 %v1218_v15, 0.0 }
 0x189   : > { %v1248_v21 = vmax.f32 %v1216_v17, 0.0  ;;  %v3607_v17 = vld [vmem:[%s5149_s7] sm:$0xff]  }
 0x18a   : > { %v1274_v22 = vpack.c.bf16 %v1250_v19, %v1249_v18  ;;  %3466 = vmatprep.subr.bf16.mxu1 %v3607_v17  ;;  %v4213_v18 = vld [vmem:[%s5146_s4] ss:$0 sm:$0xff] }
 0x18b   : > { %v1273_v23 = vpack.c.bf16 %v1248_v21, %v1247_v20  ;;  %v3372_v24 = vpop.f32.mrb[16].mxu0 }
 0x18c   : > { %v1221_v25 = vadd.f32 %v3372_v24, %v4148_v28  ;;  %v1101_v26 = vpop.f32.mrb[17].mxu0 }
 0x18d   : > { %v1219_v27 = vadd.f32 %v4148_v28, %v1101_v26  ;;  %v3373_v29 = vpop.f32.mrb[18].mxu0  ;;  %3406 = vmatprep.mubr.msk.bf16.mxu1 %vm1322_vm2, %v1273_v23 }
 0x18e   : > { %v1222_v30 = vadd.f32 %v3373_v29, %v4148_v28  ;;  %v1104_v31 = vpop.f32.mrb[19].mxu0  ;;  %3407 = vmatmul.mubr.msk.bf16.gmra.mrb[12].mxu1 %vm1322_vm2, %v1274_v22  ;;  %v1253_v33 = vmax.f32 %v1221_v25, 0.0 }
 0x18f   : > { %v1220_v32 = vadd.f32 %v4148_v28, %v1104_v31  ;;  %v1251_v35 = vmax.f32 %v1219_v27, 0.0 }
 0x190   : > { %v1254_v34 = vmax.f32 %v1222_v30, 0.0 }
 0x191   : > { %v1252_v36 = vmax.f32 %v1220_v32, 0.0 }
 0x192   : > { %v1276_v37 = vpack.c.bf16 %v1254_v34, %v1253_v33 }
 0x193   : > { %v1275_v38 = vpack.c.bf16 %v1252_v36, %v1251_v35  ;;  %v3376_v39 = vpop.f32.mrb[20].mxu0  ;;  %v3608_v36 = vld [vmem:[%s5149_s7 + $0x8] sm:$0xff]  }
 0x194   : > { %v1225_v40 = vadd.f32 %v3376_v39, %v4148_v28  ;;  %v1117_v41 = vpop.f32.mrb[21].mxu0 }
 0x195   : > { %v1223_v42 = vadd.f32 %v4148_v28, %v1117_v41  ;;  %v3377_v43 = vpop.f32.mrb[22].mxu0  ;;  %3410 = vmatprep.mubr.msk.bf16.mxu1 %vm1322_vm2, %v1275_v38 }
 0x196   : > { %v1226_v44 = vadd.f32 %v3377_v43, %v4148_v28  ;;  %v1120_v45 = vpop.f32.mrb[23].mxu0  ;;  %3411 = vmatmul.mubr.msk.bf16.gmra.mrb[16].mxu1 %vm1322_vm2, %v1276_v37  ;;  %v1257_v47 = vmax.f32 %v1225_v40, 0.0 }
 0x197   : > { %v1224_v46 = vadd.f32 %v4148_v28, %v1120_v45  ;;  %v1255_v49 = vmax.f32 %v1223_v42, 0.0 }
 0x198   : > { %v1258_v48 = vmax.f32 %v1226_v44, 0.0  ;;  %v3609_v44 = vld [vmem:[%s5149_s7 + $0x10] sm:$0xff]  }
 0x199   : > { %v1256_v50 = vmax.f32 %v1224_v46, 0.0 }
 0x19a   : > { %v1278_v51 = vpack.c.bf16 %v1258_v48, %v1257_v47 }
 0x19b   : > { %v1277_v52 = vpack.c.bf16 %v1256_v50, %v1255_v49  ;;  %v3380_v53 = vpop.f32.mrb[24].mxu0 }
 0x19c   : > { %v1229_v54 = vadd.f32 %v3380_v53, %v4148_v28  ;;  %v1133_v55 = vpop.f32.mrb[25].mxu0 }
 0x19d   : > { %v1227_v56 = vadd.f32 %v4148_v28, %v1133_v55  ;;  %v3381_v57 = vpop.f32.mrb[26].mxu0  ;;  %3414 = vmatprep.mubr.msk.bf16.mxu1 %vm1322_vm2, %v1277_v52  ;;  %v3610_v52 = vld [vmem:[%s5149_s7 + $0x18] sm:$0xff]  }
 0x19e   : > { %v1230_v58 = vadd.f32 %v3381_v57, %v4148_v28  ;;  %v1136_v59 = vpop.f32.mrb[27].mxu0  ;;  %3415 = vmatmul.mubr.msk.bf16.gmra.mrb[20].mxu1 %vm1322_vm2, %v1278_v51  ;;  %v1261_v61 = vmax.f32 %v1229_v54, 0.0 }
 0x19f   : > { %v1228_v60 = vadd.f32 %v4148_v28, %v1136_v59  ;;  %v1259_v63 = vmax.f32 %v1227_v56, 0.0 }
 0x1a0   : > { %v1262_v62 = vmax.f32 %v1230_v58, 0.0 }
 0x1a1   : > { %v1260_v0 = vmax.f32 %v1228_v60, 0.0 }
 0x1a2   : > { %v1280_v1 = vpack.c.bf16 %v1262_v62, %v1261_v61 }
 0x1a3   : > { %v1279_v2 = vpack.c.bf16 %v1260_v0, %v1259_v63  ;;  %v3384_v3 = vpop.f32.mrb[28].mxu0 }
 0x1a4   : > { %v1233_v4 = vadd.f32 %v3384_v3, %v4148_v28  ;;  %v1149_v5 = vpop.f32.mrb[29].mxu0 }
 0x1a5   : > { %v1231_v6 = vadd.f32 %v4148_v28, %v1149_v5  ;;  %v3385_v7 = vpop.f32.mrb[30].mxu0  ;;  %3418 = vmatprep.mubr.msk.bf16.mxu1 %vm1322_vm2, %v1279_v2 }
 0x1a6   : > { %v1234_v8 = vadd.f32 %v3385_v7, %v4148_v28  ;;  %v1152_v9 = vpop.f32.mrb[31].mxu0  ;;  %3419 = vmatmul.mubr.msk.bf16.gmra.mrb[24].mxu1 %vm1322_vm2, %v1280_v1  ;;  %v1265_v11 = vmax.f32 %v1233_v4, 0.0 }
 0x1a7   : > { %v1232_v10 = vadd.f32 %v4148_v28, %v1152_v9  ;;  %v1263_v13 = vmax.f32 %v1231_v6, 0.0 }
 0x1a8   : > { %v1266_v12 = vmax.f32 %v1234_v8, 0.0 }
 0x1a9   : > { %v1264_v14 = vmax.f32 %v1232_v10, 0.0 }
 0x1aa   : > { %v1282_v15 = vpack.c.bf16 %v1266_v12, %v1265_v11 }
 0x1ab   : > { %v1281_v16 = vpack.c.bf16 %v1264_v14, %v1263_v13 }
 0x1ad   : > { %3422 = vmatprep.mubr.msk.bf16.mxu1 %vm1322_vm2, %v1281_v16 }
 0x1ae   : > { %3423 = vmatmul.mubr.msk.bf16.gmra.mrb[28].mxu1 %vm1322_vm2, %v1282_v15 }
 0x249   : > { %v3396_v28 = vpop.f32.mrb[0].mxu1 }
 0x24a   : > { %v1414_v19 = vadd.f32 %v3396_v28, %v4213_v18  ;;  %v1405_v20 = vpop.f32.mrb[1].mxu1 }
 0x24b   : > { %v1406_v21 = vadd.f32 %v4213_v18, %v1405_v20  ;;  %v3397_v22 = vpop.f32.mrb[2].mxu1 }
 0x24c   : > { %v1417_v23 = vadd.f32 %v3397_v22, %v4213_v18  ;;  %v1408_v24 = vpop.f32.mrb[3].mxu1  ;;  %v1534_v26 = vmax.f32 %v1414_v19, 0.0 }
 0x24d   : > { %v1409_v25 = vadd.f32 %v4213_v18, %v1408_v24  ;;  %v1532_v29 = vmax.f32 %v1406_v21, 0.0 }
 0x24e   : > { %v1535_v27 = vmax.f32 %v1417_v23, 0.0 }
 0x24f   : > { %v1533_v30 = vmax.f32 %v1409_v25, 0.0 }
 0x250   : > { %v1565_v31 = vpack.c.bf16 %v1535_v27, %v1534_v26 }
 0x251   : > { %v1564_v32 = vpack.c.bf16 %v1533_v30, %v1532_v29  ;;  %v3400_v33 = vpop.f32.mrb[4].mxu1 }
 0x252   : > { %v1430_v34 = vadd.f32 %v3400_v33, %v4213_v18  ;;  %v1421_v35 = vpop.f32.mrb[5].mxu1 }
 0x253   : > { %v1422_v37 = vadd.f32 %v4213_v18, %v1421_v35  ;;  %v3401_v38 = vpop.f32.mrb[6].mxu1  ;;  %3434 = vmatprep.mubr.msk.bf16.mxu1 %vm1322_vm2, %v1564_v32 }
 0x254   : > { %v1433_v39 = vadd.f32 %v3401_v38, %v4213_v18  ;;  %v1424_v40 = vpop.f32.mrb[7].mxu1  ;;  %3435 = vmatmul.mubr.msk.bf16.vlgmr.msra.gmra.mrb[32].mxu1 %vm1322_vm2, %v1565_v31  ;;  %v1538_v42 = vmax.f32 %v1430_v34, 0.0 }
 0x255   : > { %v1425_v41 = vadd.f32 %v4213_v18, %v1424_v40  ;;  %3467 = vmatpush3.bf16.msra.mxu1 %v3607_v17  ;;  %v1536_v45 = vmax.f32 %v1422_v37, 0.0 }
 0x256   : > { %v1539_v43 = vmax.f32 %v1433_v39, 0.0  ;;  %3468 = vmatprep.subr.bf16.mxu1 %v3608_v36 }
 0x257   : > { %v1537_v46 = vmax.f32 %v1425_v41, 0.0 }
 0x258   : > { %v1567_v47 = vpack.c.bf16 %v1539_v43, %v1538_v42 }
 0x259   : > { %v1566_v48 = vpack.c.bf16 %v1537_v46, %v1536_v45  ;;  %v3404_v49 = vpop.f32.mrb[8].mxu1  ;;  %3469 = vmatpush3.bf16.msra.mxu1 %v3608_v36 }
 0x25a   : > { %v1446_v50 = vadd.f32 %v3404_v49, %v4213_v18  ;;  %v1437_v51 = vpop.f32.mrb[9].mxu1  ;;  %3470 = vmatprep.subr.bf16.mxu1 %v3609_v44 }
 0x25b   : > { %v1438_v53 = vadd.f32 %v4213_v18, %v1437_v51  ;;  %v3405_v54 = vpop.f32.mrb[10].mxu1  ;;  %3438 = vmatprep.mubr.msk.bf16.mxu1 %vm1322_vm2, %v1566_v48 }
 0x25c   : > { %v1449_v55 = vadd.f32 %v3405_v54, %v4213_v18  ;;  %v1440_v56 = vpop.f32.mrb[11].mxu1  ;;  %3439 = vmatmul.mubr.msk.bf16.gmra.mrb[36].mxu1 %vm1322_vm2, %v1567_v47  ;;  %v1542_v58 = vmax.f32 %v1446_v50, 0.0 }
 0x25d   : > { %v1441_v57 = vadd.f32 %v4213_v18, %v1440_v56  ;;  %3471 = vmatpush3.bf16.msra.mxu1 %v3609_v44  ;;  %v1540_v60 = vmax.f32 %v1438_v53, 0.0 }
 0x25e   : > { %v1543_v59 = vmax.f32 %v1449_v55, 0.0  ;;  %3472 = vmatprep.subr.bf16.mxu1 %v3610_v52 }
 0x25f   : > { %v1541_v61 = vmax.f32 %v1441_v57, 0.0 }
 0x260   : > { %v1569_v62 = vpack.c.bf16 %v1543_v59, %v1542_v58 }
 0x261   : > { %v1568_v63 = vpack.c.bf16 %v1541_v61, %v1540_v60  ;;  %v3408_v0 = vpop.f32.mrb[12].mxu1  ;;  %3473 = vmatpush3.bf16.msra.mxu1 %v3610_v52 }
 0x262   : > { %v1462_v1 = vadd.f32 %v3408_v0, %v4213_v18  ;;  %v1453_v2 = vpop.f32.mrb[13].mxu1 }
 0x263   : > { %v1454_v3 = vadd.f32 %v4213_v18, %v1453_v2  ;;  %v3409_v4 = vpop.f32.mrb[14].mxu1  ;;  %3442 = vmatprep.mubr.msk.bf16.mxu1 %vm1322_vm2, %v1568_v63 }
 0x264   : > { %v1465_v5 = vadd.f32 %v3409_v4, %v4213_v18  ;;  %v1456_v6 = vpop.f32.mrb[15].mxu1  ;;  %3443 = vmatmul.mubr.msk.bf16.gmra.mrb[40].mxu1 %vm1322_vm2, %v1569_v62  ;;  %v1546_v8 = vmax.f32 %v1462_v1, 0.0 }
 0x265   : > { %v1457_v7 = vadd.f32 %v4213_v18, %v1456_v6  ;;  %v1544_v10 = vmax.f32 %v1454_v3, 0.0 }
 0x266   : > { %v1547_v9 = vmax.f32 %v1465_v5, 0.0 }
 0x267   : > { %v1545_v11 = vmax.f32 %v1457_v7, 0.0  ;;  %v4275_v7 = vld [vmem:[%s5148_s6] ss:$0 sm:$0xff] }
 0x268   : > { %v1571_v12 = vpack.c.bf16 %v1547_v9, %v1546_v8 }
 0x269   : > { %v1570_v13 = vpack.c.bf16 %v1545_v11, %v1544_v10  ;;  %v3412_v14 = vpop.f32.mrb[16].mxu1 }
 0x26a   : > { %v1478_v15 = vadd.f32 %v3412_v14, %v4213_v18  ;;  %v1469_v16 = vpop.f32.mrb[17].mxu1 }
 0x26b   : > { %v1470_v17 = vadd.f32 %v4213_v18, %v1469_v16  ;;  %v3413_v28 = vpop.f32.mrb[18].mxu1  ;;  %3446 = vmatprep.mubr.msk.bf16.mxu1 %vm1322_vm2, %v1570_v13 }
 0x26c   : > { %v1481_v19 = vadd.f32 %v3413_v28, %v4213_v18  ;;  %v1472_v20 = vpop.f32.mrb[19].mxu1  ;;  %3447 = vmatmul.mubr.msk.bf16.gmra.mrb[44].mxu1 %vm1322_vm2, %v1571_v12  ;;  %v1550_v22 = vmax.f32 %v1478_v15, 0.0 }
 0x26d   : > { %v1473_v21 = vadd.f32 %v4213_v18, %v1472_v20  ;;  %v1548_v24 = vmax.f32 %v1470_v17, 0.0 }
 0x26e   : > { %v1551_v23 = vmax.f32 %v1481_v19, 0.0 }
 0x26f   : > { %v1549_v25 = vmax.f32 %v1473_v21, 0.0 }
 0x270   : > { %v1573_v26 = vpack.c.bf16 %v1551_v23, %v1550_v22 }
 0x271   : > { %v1572_v27 = vpack.c.bf16 %v1549_v25, %v1548_v24  ;;  %v3416_v29 = vpop.f32.mrb[20].mxu1 }
 0x272   : > { %v1494_v30 = vadd.f32 %v3416_v29, %v4213_v18  ;;  %v1485_v31 = vpop.f32.mrb[21].mxu1 }
 0x273   : > { %v1486_v32 = vadd.f32 %v4213_v18, %v1485_v31  ;;  %v3417_v33 = vpop.f32.mrb[22].mxu1  ;;  %3450 = vmatprep.mubr.msk.bf16.mxu1 %vm1322_vm2, %v1572_v27 }
 0x274   : > { %v1497_v34 = vadd.f32 %v3417_v33, %v4213_v18  ;;  %v1488_v35 = vpop.f32.mrb[23].mxu1  ;;  %3451 = vmatmul.mubr.msk.bf16.gmra.mrb[48].mxu1 %vm1322_vm2, %v1573_v26  ;;  %v1554_v37 = vmax.f32 %v1494_v30, 0.0 }
 0x275   : > { %v1489_v36 = vadd.f32 %v4213_v18, %v1488_v35  ;;  %v1552_v39 = vmax.f32 %v1486_v32, 0.0 }
 0x276   : > { %v1555_v38 = vmax.f32 %v1497_v34, 0.0 }
 0x277   : > { %v1553_v40 = vmax.f32 %v1489_v36, 0.0 }
 0x278   : > { %v1575_v41 = vpack.c.bf16 %v1555_v38, %v1554_v37 }
 0x279   : > { %v1574_v42 = vpack.c.bf16 %v1553_v40, %v1552_v39  ;;  %v3420_v43 = vpop.f32.mrb[24].mxu1 }
 0x27a   : > { %v1510_v44 = vadd.f32 %v3420_v43, %v4213_v18  ;;  %v1501_v45 = vpop.f32.mrb[25].mxu1 }
 0x27b   : > { %v1502_v46 = vadd.f32 %v4213_v18, %v1501_v45  ;;  %v3421_v47 = vpop.f32.mrb[26].mxu1  ;;  %3454 = vmatprep.mubr.msk.bf16.mxu1 %vm1322_vm2, %v1574_v42 }
 0x27c   : > { %v1513_v48 = vadd.f32 %v3421_v47, %v4213_v18  ;;  %v1504_v49 = vpop.f32.mrb[27].mxu1  ;;  %3455 = vmatmul.mubr.msk.bf16.gmra.mrb[52].mxu1 %vm1322_vm2, %v1575_v41  ;;  %v1558_v51 = vmax.f32 %v1510_v44, 0.0 }
 0x27d   : > { %v1505_v50 = vadd.f32 %v4213_v18, %v1504_v49  ;;  %v1556_v53 = vmax.f32 %v1502_v46, 0.0 }
 0x27e   : > { %v1559_v52 = vmax.f32 %v1513_v48, 0.0 }
 0x27f   : > { %v1557_v54 = vmax.f32 %v1505_v50, 0.0 }
 0x280   : > { %v1577_v55 = vpack.c.bf16 %v1559_v52, %v1558_v51 }
 0x281   : > { %v1576_v56 = vpack.c.bf16 %v1557_v54, %v1556_v53  ;;  %v3424_v57 = vpop.f32.mrb[28].mxu1 }
 0x282   : > { %v1526_v58 = vadd.f32 %v3424_v57, %v4213_v18  ;;  %v1517_v59 = vpop.f32.mrb[29].mxu1 }
 0x283   : > { %v1518_v60 = vadd.f32 %v4213_v18, %v1517_v59  ;;  %v3425_v61 = vpop.f32.mrb[30].mxu1  ;;  %3458 = vmatprep.mubr.msk.bf16.mxu1 %vm1322_vm2, %v1576_v56 }
 0x284   : > { %v1529_v62 = vadd.f32 %v3425_v61, %v4213_v18  ;;  %v1520_v63 = vpop.f32.mrb[31].mxu1  ;;  %3459 = vmatmul.mubr.msk.bf16.gmra.mrb[56].mxu1 %vm1322_vm2, %v1577_v55  ;;  %v1562_v1 = vmax.f32 %v1526_v58, 0.0 }
 0x285   : > { %v1521_v0 = vadd.f32 %v4213_v18, %v1520_v63  ;;  %v1560_v3 = vmax.f32 %v1518_v60, 0.0 }
 0x286   : > { %v1563_v2 = vmax.f32 %v1529_v62, 0.0 }
 0x287   : > { %v1561_v4 = vmax.f32 %v1521_v0, 0.0 }
 0x288   : > { %v1579_v5 = vpack.c.bf16 %v1563_v2, %v1562_v1 }
 0x289   : > { %v1578_v6 = vpack.c.bf16 %v1561_v4, %v1560_v3 }
 0x28b   : > { %3462 = vmatprep.mubr.msk.bf16.mxu1 %vm1322_vm2, %v1578_v6 }
 0x28c   : > { %3463 = vmatmul.mubr.msk.bf16.gmra.mrb[60].mxu1 %vm1322_vm2, %v1579_v5 }
 0x327   : > { %v3436_v8 = vpop.f32.mrb[32].mxu1 }
 0x328   : > { %v1710_v9 = vadd.f32 %v3436_v8, %v4275_v7  ;;  %v1701_v10 = vpop.f32.mrb[33].mxu1 }
 0x329   : > { %v1702_v18 = vadd.f32 %v4275_v7, %v1701_v10  ;;  %v3437_v11 = vpop.f32.mrb[34].mxu1 }
 0x32a   : > { %v1713_v12 = vadd.f32 %v3437_v11, %v4275_v7  ;;  %v1704_v13 = vpop.f32.mrb[35].mxu1  ;;  %v1830_v15 = vmax.f32 %v1710_v9, 0.0 }
 0x32b   : > { %v1705_v14 = vadd.f32 %v4275_v7, %v1704_v13  ;;  %v1828_v17 = vmax.f32 %v1702_v18, 0.0 }
 0x32c   : > { %v1831_v16 = vmax.f32 %v1713_v12, 0.0 }
 0x32d   : > { %v1829_v28 = vmax.f32 %v1705_v14, 0.0 }
 0x32e   : > { %v1861_v19 = vpack.c.bf16 %v1831_v16, %v1830_v15 }
 0x32f   : > { %v1860_v20 = vpack.c.bf16 %v1829_v28, %v1828_v17  ;;  %v3440_v21 = vpop.f32.mrb[36].mxu1 }
 0x330   : > { %v1726_v22 = vadd.f32 %v3440_v21, %v4275_v7  ;;  %v1717_v23 = vpop.f32.mrb[37].mxu1 }
 0x331   : > { %v1718_v24 = vadd.f32 %v4275_v7, %v1717_v23  ;;  %v3441_v25 = vpop.f32.mrb[38].mxu1  ;;  %3474 = vmatprep.mubr.msk.bf16.mxu1 %vm1322_vm2, %v1860_v20 }
 0x332   : > { %v1729_v26 = vadd.f32 %v3441_v25, %v4275_v7  ;;  %v1720_v27 = vpop.f32.mrb[39].mxu1  ;;  %3475 = vmatmul.mubr.msk.bf16.vlgmr.msra.gmra.mrb[64].mxu1 %vm1322_vm2, %v1861_v19  ;;  %v1834_v30 = vmax.f32 %v1726_v22, 0.0 }
 0x333   : > { %v1721_v29 = vadd.f32 %v4275_v7, %v1720_v27  ;;  %v1832_v32 = vmax.f32 %v1718_v24, 0.0 }
 0x334   : > { %v1835_v31 = vmax.f32 %v1729_v26, 0.0 }
 0x335   : > { %v1833_v33 = vmax.f32 %v1721_v29, 0.0 }
 0x336   : > { %v1863_v34 = vpack.c.bf16 %v1835_v31, %v1834_v30 }
 0x337   : > { %v1862_v35 = vpack.c.bf16 %v1833_v33, %v1832_v32  ;;  %v3444_v36 = vpop.f32.mrb[40].mxu1 }
 0x338   : > { %v1742_v37 = vadd.f32 %v3444_v36, %v4275_v7  ;;  %v1733_v38 = vpop.f32.mrb[41].mxu1 }
 0x339   : > { %v1734_v39 = vadd.f32 %v4275_v7, %v1733_v38  ;;  %v3445_v40 = vpop.f32.mrb[42].mxu1  ;;  %3478 = vmatprep.mubr.msk.bf16.mxu1 %vm1322_vm2, %v1862_v35 }
 0x33a   : > { %v1745_v41 = vadd.f32 %v3445_v40, %v4275_v7  ;;  %v1736_v42 = vpop.f32.mrb[43].mxu1  ;;  %3479 = vmatmul.mubr.msk.bf16.gmra.mrb[68].mxu1 %vm1322_vm2, %v1863_v34  ;;  %v1838_v44 = vmax.f32 %v1742_v37, 0.0 }
 0x33b   : > { %v1737_v43 = vadd.f32 %v4275_v7, %v1736_v42  ;;  %v1836_v46 = vmax.f32 %v1734_v39, 0.0 }
 0x33c   : > { %v1839_v45 = vmax.f32 %v1745_v41, 0.0 }
 0x33d   : > { %v1837_v47 = vmax.f32 %v1737_v43, 0.0 }
 0x33e   : > { %v1865_v48 = vpack.c.bf16 %v1839_v45, %v1838_v44 }
 0x33f   : > { %v1864_v49 = vpack.c.bf16 %v1837_v47, %v1836_v46  ;;  %v3448_v50 = vpop.f32.mrb[44].mxu1 }
 0x340   : > { %v1758_v51 = vadd.f32 %v3448_v50, %v4275_v7  ;;  %v1749_v52 = vpop.f32.mrb[45].mxu1 }
 0x341   : > { %v1750_v53 = vadd.f32 %v4275_v7, %v1749_v52  ;;  %v3449_v54 = vpop.f32.mrb[46].mxu1  ;;  %3482 = vmatprep.mubr.msk.bf16.mxu1 %vm1322_vm2, %v1864_v49 }
 0x342   : > { %v1761_v55 = vadd.f32 %v3449_v54, %v4275_v7  ;;  %v1752_v56 = vpop.f32.mrb[47].mxu1  ;;  %3483 = vmatmul.mubr.msk.bf16.gmra.mrb[72].mxu1 %vm1322_vm2, %v1865_v48  ;;  %v1842_v58 = vmax.f32 %v1758_v51, 0.0 }
 0x343   : > { %v1753_v57 = vadd.f32 %v4275_v7, %v1752_v56  ;;  %v1840_v60 = vmax.f32 %v1750_v53, 0.0 }
 0x344   : > { %v1843_v59 = vmax.f32 %v1761_v55, 0.0 }
 0x345   : > { %v1841_v61 = vmax.f32 %v1753_v57, 0.0  ;;  %v2124_v57 = vlaneseq }
 0x346   : > { %v1867_v62 = vpack.c.bf16 %v1843_v59, %v1842_v58  ;;  %v4330_v59 = vld [vmem:[%s5150_s8] ss:$0 sm:$0xff] }
 0x347   : > { %v1866_v63 = vpack.c.bf16 %v1841_v61, %v1840_v60  ;;  %v3452_v0 = vpop.f32.mrb[48].mxu1  ;;  %v4325_v58 = vand.u32 127, %v2124_v57 }
 0x348   : > { %v1774_v1 = vadd.f32 %v3452_v0, %v4275_v7  ;;  %v1765_v2 = vpop.f32.mrb[49].mxu1 }
 0x349   : > { %v1766_v3 = vadd.f32 %v4275_v7, %v1765_v2  ;;  %v3453_v4 = vpop.f32.mrb[50].mxu1  ;;  %3486 = vmatprep.mubr.msk.bf16.mxu1 %vm1322_vm2, %v1866_v63  ;;  %5199 = vst [vmem:[#allocation2_spill] sm:$0xff] %v4325_v58  ;;  %vm2382_vm3 = vcmp.ge.s32.totalorder %v4325_v58, 4 }
 0x34a   : > { %v1777_v5 = vadd.f32 %v3453_v4, %v4275_v7  ;;  %v1768_v6 = vpop.f32.mrb[51].mxu1  ;;  %3487 = vmatmul.mubr.msk.bf16.gmra.mrb[76].mxu1 %vm1322_vm2, %v1867_v62  ;;  %v1846_v9 = vmax.f32 %v1774_v1, 0.0 }
 0x34b   : > { %v1769_v8 = vadd.f32 %v4275_v7, %v1768_v6  ;;  %v1844_v18 = vmax.f32 %v1766_v3, 0.0 }
 0x34c   : > { %v1847_v10 = vmax.f32 %v1777_v5, 0.0 }
 0x34d   : > { %v1845_v11 = vmax.f32 %v1769_v8, 0.0 }
 0x34e   : > { %v1869_v12 = vpack.c.bf16 %v1847_v10, %v1846_v9 }
 0x34f   : > { %v1868_v13 = vpack.c.bf16 %v1845_v11, %v1844_v18  ;;  %v3456_v14 = vpop.f32.mrb[52].mxu1 }
 0x350   : > { %v1790_v15 = vadd.f32 %v3456_v14, %v4275_v7  ;;  %v1781_v16 = vpop.f32.mrb[53].mxu1 }
 0x351   : > { %v1782_v17 = vadd.f32 %v4275_v7, %v1781_v16  ;;  %v3457_v28 = vpop.f32.mrb[54].mxu1  ;;  %3490 = vmatprep.mubr.msk.bf16.mxu1 %vm1322_vm2, %v1868_v13 }
 0x352   : > { %v1793_v19 = vadd.f32 %v3457_v28, %v4275_v7  ;;  %v1784_v20 = vpop.f32.mrb[55].mxu1  ;;  %3491 = vmatmul.mubr.msk.bf16.gmra.mrb[80].mxu1 %vm1322_vm2, %v1869_v12  ;;  %v1850_v22 = vmax.f32 %v1790_v15, 0.0 }
 0x353   : > { %v1785_v21 = vadd.f32 %v4275_v7, %v1784_v20  ;;  %v1848_v24 = vmax.f32 %v1782_v17, 0.0 }
 0x354   : > { %v1851_v23 = vmax.f32 %v1793_v19, 0.0 }
 0x355   : > { %v1849_v25 = vmax.f32 %v1785_v21, 0.0 }
 0x356   : > { %v1871_v26 = vpack.c.bf16 %v1851_v23, %v1850_v22 }
 0x357   : > { %v1870_v27 = vpack.c.bf16 %v1849_v25, %v1848_v24  ;;  %v3460_v29 = vpop.f32.mrb[56].mxu1 }
 0x358   : > { %v1806_v30 = vadd.f32 %v3460_v29, %v4275_v7  ;;  %v1797_v31 = vpop.f32.mrb[57].mxu1 }
 0x359   : > { %v1798_v32 = vadd.f32 %v4275_v7, %v1797_v31  ;;  %v3461_v33 = vpop.f32.mrb[58].mxu1  ;;  %3494 = vmatprep.mubr.msk.bf16.mxu1 %vm1322_vm2, %v1870_v27 }
 0x35a   : > { %v1809_v34 = vadd.f32 %v3461_v33, %v4275_v7  ;;  %v1800_v35 = vpop.f32.mrb[59].mxu1  ;;  %3495 = vmatmul.mubr.msk.bf16.gmra.mrb[84].mxu1 %vm1322_vm2, %v1871_v26  ;;  %v1854_v37 = vmax.f32 %v1806_v30, 0.0 }
 0x35b   : > { %v1801_v36 = vadd.f32 %v4275_v7, %v1800_v35  ;;  %v1852_v39 = vmax.f32 %v1798_v32, 0.0 }
 0x35c   : > { %v1855_v38 = vmax.f32 %v1809_v34, 0.0 }
 0x35d   : > { %v1853_v40 = vmax.f32 %v1801_v36, 0.0 }
 0x35e   : > { %v1873_v41 = vpack.c.bf16 %v1855_v38, %v1854_v37 }
 0x35f   : > { %v1872_v42 = vpack.c.bf16 %v1853_v40, %v1852_v39  ;;  %v3464_v43 = vpop.f32.mrb[60].mxu1 }
 0x360   : > { %v1822_v44 = vadd.f32 %v3464_v43, %v4275_v7  ;;  %v1813_v45 = vpop.f32.mrb[61].mxu1 }
 0x361   : > { %v1814_v46 = vadd.f32 %v4275_v7, %v1813_v45  ;;  %v3465_v47 = vpop.f32.mrb[62].mxu1  ;;  %3498 = vmatprep.mubr.msk.bf16.mxu1 %vm1322_vm2, %v1872_v42 }
 0x362   : > { %v1825_v48 = vadd.f32 %v3465_v47, %v4275_v7  ;;  %v1816_v49 = vpop.f32.mrb[63].mxu1  ;;  %3499 = vmatmul.mubr.msk.bf16.gmra.mrb[88].mxu1 %vm1322_vm2, %v1873_v41  ;;  %v1858_v51 = vmax.f32 %v1822_v44, 0.0 }
 0x363   : > { %v1817_v50 = vadd.f32 %v4275_v7, %v1816_v49  ;;  %v1856_v53 = vmax.f32 %v1814_v46, 0.0 }
 0x364   : > { %v1859_v52 = vmax.f32 %v1825_v48, 0.0 }
 0x365   : > { %v1857_v54 = vmax.f32 %v1817_v50, 0.0 }
 0x366   : > { %v1875_v55 = vpack.c.bf16 %v1859_v52, %v1858_v51 }
 0x367   : > { %v1874_v56 = vpack.c.bf16 %v1857_v54, %v1856_v53 }
 0x369   : > { %3502 = vmatprep.mubr.msk.bf16.mxu1 %vm1322_vm2, %v1874_v56 }
 0x36a   : > { %3503 = vmatmul.mubr.msk.bf16.gmra.mrb[92].mxu1 %vm1322_vm2, %v1875_v55 }
 0x405   : > { %v3476_v60 = vpop.f32.mrb[64].mxu1 }
 0x406   : > { %v4334_v7 = vadd.f32 %v3476_v60, %v4330_v59  ;;  %v1997_v61 = vpop.f32.mrb[65].mxu1 }
 0x407   : > { %v4337_v62 = vadd.f32 %v4330_v59, %v1997_v61  ;;  %v3477_v63 = vpop.f32.mrb[66].mxu1 }
 0x408   : > { %v4340_v0 = vadd.f32 %v3477_v63, %v4330_v59  ;;  %v2000_v1 = vpop.f32.mrb[67].mxu1  ;;  %v4345_v2 = vsel %vm2382_vm3, %v4334_v7, -inf }
 0x409   : > { %v4348_v3 = vadd.f32 %v4330_v59, %v2000_v1  ;;  %v2422_v4 = vsel %vm2415_vm4, %v4345_v2, -inf  ;;  %v4355_v5 = vsel %vm2382_vm3, %v4337_v62, -inf }
 0x40a   : > { %2423 = vmax.xlane.f32.xlu1 %v2422_v4  ;;  %v2416_v6 = vsel %vm2415_vm4, %v4355_v5, -inf  ;;  %v4362_v8 = vsel %vm2382_vm3, %v4340_v0, -inf }
 0x40b   : > { %2417 = vmax.xlane.f32.xlu0 %v2416_v6  ;;  %v4367_v9 = vsel %vm2382_vm3, %v4348_v3, -inf  ;;  %v2425_v18 = vsel %vm2415_vm4, %v4362_v8, -inf }
 0x40c   : > { %v2419_v13 = vsel %vm2415_vm4, %v4367_v9, -inf }
 0x40d   : > { %v3480_v10 = vpop.f32.mrb[68].mxu1 }
 0x40e   : > { %v4372_v11 = vadd.f32 %v3480_v10, %v4330_v59  ;;  %2426 = vmax.xlane.f32.xlu1 %v2425_v18  ;;  %v2013_v12 = vpop.f32.mrb[69].mxu1 }
 0x40f   : > { %v4377_v14 = vadd.f32 %v4330_v59, %v2013_v12  ;;  %v3481_v15 = vpop.f32.mrb[70].mxu1  ;;  %2420 = vmax.xlane.f32.xlu0 %v2419_v13 }
 0x410   : > { %v4380_v16 = vadd.f32 %v3481_v15, %v4330_v59  ;;  %v2016_v17 = vpop.f32.mrb[71].mxu1  ;;  %v4385_v28 = vsel %vm2382_vm3, %v4372_v11, -inf }
 0x411   : > { %v4388_v19 = vadd.f32 %v4330_v59, %v2016_v17  ;;  %v2434_v20 = vsel %vm2415_vm4, %v4385_v28, -inf  ;;  %v4402_v23 = vsel %vm2382_vm3, %v4377_v14, -inf }
 0x412   : > { %v4395_v21 = vsel %vm2382_vm3, %v4380_v16, -inf  ;;  %v2428_v29 = vsel %vm2415_vm4, %v4402_v23, -inf }
 0x413   : > { %2435 = vmax.xlane.f32.xlu0 %v2434_v20  ;;  %v2437_v22 = vsel %vm2415_vm4, %v4395_v21, -inf  ;;  %v4407_v24 = vsel %vm2382_vm3, %v4388_v19, -inf }
 0x414   : > { %2438 = vmax.xlane.f32.xlu1 %v2437_v22  ;;  %v2431_v31 = vsel %vm2415_vm4, %v4407_v24, -inf }
 0x415   : > { %v3484_v25 = vpop.f32.mrb[72].mxu1 }
 0x416   : > { %v4410_v26 = vadd.f32 %v3484_v25, %v4330_v59  ;;  %v2029_v27 = vpop.f32.mrb[73].mxu1 }
 0x417   : > { %v3485_v30 = vpop.f32.mrb[74].mxu1  ;;  %2429 = vmax.xlane.f32.xlu0 %v2428_v29  ;;  %v4417_v32 = vadd.f32 %v4330_v59, %v2029_v27 }
 0x418   : > { %v4420_v33 = vadd.f32 %v3485_v30, %v4330_v59  ;;  %v2032_v34 = vpop.f32.mrb[75].mxu1  ;;  %2432 = vmax.xlane.f32.xlu1 %v2431_v31  ;;  %v4425_v35 = vsel %vm2382_vm3, %v4410_v26, -inf }
 0x419   : > { %v4428_v36 = vadd.f32 %v4330_v59, %v2032_v34  ;;  %v2446_v37 = vsel %vm2415_vm4, %v4425_v35, -inf  ;;  %v4440_v39 = vsel %vm2382_vm3, %v4417_v32, -inf }
 0x41a   : > { %v4435_v38 = vsel %vm2382_vm3, %v4420_v33, -inf  ;;  %v2440_v46 = vsel %vm2415_vm4, %v4440_v39, -inf }
 0x41b   : > { %2447 = vmax.xlane.f32.xlu0 %v2446_v37  ;;  %v2449_v40 = vsel %vm2415_vm4, %v4435_v38, -inf  ;;  %v4447_v43 = vsel %vm2382_vm3, %v4428_v36, -inf }
 0x41c   : > { %2450 = vmax.xlane.f32.xlu1 %v2449_v40  ;;  %v2443_v49 = vsel %vm2415_vm4, %v4447_v43, -inf }
 0x41d   : > { %v3488_v41 = vpop.f32.mrb[76].mxu1 }
 0x41e   : > { %v2045_v42 = vpop.f32.mrb[77].mxu1  ;;  %v4450_v44 = vadd.f32 %v3488_v41, %v4330_v59 }
 0x41f   : > { %v3489_v45 = vpop.f32.mrb[78].mxu1  ;;  %2441 = vmax.xlane.f32.xlu0 %v2440_v46  ;;  %v4472_v54 = vadd.f32 %v4330_v59, %v2045_v42 }
 0x420   : > { %v2048_v47 = vpop.f32.mrb[79].mxu1  ;;  %v4455_v48 = vadd.f32 %v3489_v45, %v4330_v59  ;;  %2444 = vmax.xlane.f32.xlu1 %v2443_v49  ;;  %v4462_v50 = vsel %vm2382_vm3, %v4450_v44, -inf }
 0x421   : > { %v2458_v51 = vsel %vm2415_vm4, %v4462_v50, -inf  ;;  %v4477_v61 = vadd.f32 %v4330_v59, %v2048_v47  ;;  %v4482_v63 = vsel %vm2382_vm3, %v4472_v54, -inf }
 0x422   : > { %v4469_v52 = vsel %vm2382_vm3, %v4455_v48, -inf  ;;  %v2452_v1 = vsel %vm2415_vm4, %v4482_v63, -inf }
 0x423   : > { %2459 = vmax.xlane.f32.xlu0 %v2458_v51  ;;  %v2461_v55 = vsel %vm2415_vm4, %v4469_v52, -inf  ;;  %v4495_v18 = vsel %vm2382_vm3, %v4477_v61, -inf }
 0x424   : > { %2462 = vmax.xlane.f32.xlu1 %v2461_v55  ;;  %v2455_v17 = vsel %vm2415_vm4, %v4495_v18, -inf }
 0x425   : > { %v3492_v53 = vpop.f32.mrb[80].mxu1 }
 0x426   : > { %v2061_v56 = vpop.f32.mrb[81].mxu1  ;;  %v4487_v4 = vadd.f32 %v3492_v53, %v4330_v59 }
 0x427   : > { %v3493_v57 = vpop.f32.mrb[82].mxu1  ;;  %2453 = vmax.xlane.f32.xlu0 %v2452_v1  ;;  %v4498_v15 = vadd.f32 %v4330_v59, %v2061_v56 }
 0x428   : > { %v2064_v60 = vpop.f32.mrb[83].mxu1  ;;  %5200 = vst [vmem:[#allocation3_spill] sm:$0xff] %v4487_v4  ;;  %v4490_v10 = vadd.f32 %v3493_v57, %v4330_v59  ;;  %2456 = vmax.xlane.f32.xlu1 %v2455_v17  ;;  %v4505_v22 = vsel %vm2382_vm3, %v4487_v4, -inf }
 0x429   : > { %5202 = vst [vmem:[#allocation5_spill] sm:$0xff] %v4498_v15  ;;  %v2470_v25 = vsel %vm2415_vm4, %v4505_v22, -inf  ;;  %v4519_v30 = vsel %vm2382_vm3, %v4498_v15, -inf  ;;  %v4524_v40 = vadd.f32 %v4330_v59, %v2064_v60 }
 0x42a   : > { %5201 = vst [vmem:[#allocation4_spill] sm:$0xff] %v4490_v10  ;;  %v4512_v27 = vsel %vm2382_vm3, %v4490_v10, -inf  ;;  %v2464_v34 = vsel %vm2415_vm4, %v4519_v30, -inf }
 0x42b   : > { %2471 = vmax.xlane.f32.xlu0 %v2470_v25  ;;  %v2473_v29 = vsel %vm2415_vm4, %v4512_v27, -inf  ;;  %5203 = vst [vmem:[#allocation6_spill] sm:$0xff] %v4524_v40  ;;  %v4535_v47 = vsel %vm2382_vm3, %v4524_v40, -inf }
 0x42c   : > { %2474 = vmax.xlane.f32.xlu1 %v2473_v29  ;;  %v2467_v51 = vsel %vm2415_vm4, %v4535_v47, -inf }
 0x42d   : > { %v3496_v6 = vpop.f32.mrb[84].mxu1 }
 0x42e   : > { %v2077_v12 = vpop.f32.mrb[85].mxu1  ;;  %v4527_v41 = vadd.f32 %v3496_v6, %v4330_v59 }
 0x42f   : > { %v3497_v13 = vpop.f32.mrb[86].mxu1  ;;  %2465 = vmax.xlane.f32.xlu0 %v2464_v34  ;;  %v4547_v55 = vadd.f32 %v4330_v59, %v2077_v12 }
 0x430   : > { %v2080_v20 = vpop.f32.mrb[87].mxu1  ;;  %5204 = vst [vmem:[#allocation7_spill] sm:$0xff] %v4527_v41  ;;  %v4530_v42 = vadd.f32 %v3497_v13, %v4330_v59  ;;  %v4540_v49 = vsel %vm2382_vm3, %v4527_v41, -inf  ;;  %2468 = vmax.xlane.f32.xlu1 %v2467_v51 }
 0x431   : > { %v2482_v53 = vsel %vm2415_vm4, %v4540_v49, -inf  ;;  %5206 = vst [vmem:[#allocation9_spill] sm:$0xff] %v4547_v55  ;;  %v4557_v6 = vadd.f32 %v4330_v59, %v2080_v20  ;;  %v4568_v25 = vsel %vm2382_vm3, %v4547_v55, -inf }
 0x432   : > { %5205 = vst [vmem:[#allocation8_spill] sm:$0xff] %v4530_v42  ;;  %v4552_v56 = vsel %vm2382_vm3, %v4530_v42, -inf  ;;  %v2476_v34 = vsel %vm2415_vm4, %v4568_v25, -inf }
 0x433   : > { %2483 = vmax.xlane.f32.xlu0 %v2482_v53  ;;  %v2485_v60 = vsel %vm2415_vm4, %v4552_v56, -inf  ;;  %5207 = vst [vmem:[#allocation10_spill] sm:$0xff] %v4557_v6  ;;  %v4575_v20 = vsel %vm2382_vm3, %v4557_v6, -inf }
 0x434   : > { %2486 = vmax.xlane.f32.xlu1 %v2485_v60 }
 0x435   : > { %v3500_v31 = vpop.f32.mrb[88].mxu1 }
 0x436   : > { %v2093_v37 = vpop.f32.mrb[89].mxu1  ;;  %v4560_v13 = vadd.f32 %v3500_v31, %v4330_v59 }
 0x437   : > { %v3501_v45 = vpop.f32.mrb[90].mxu1  ;;  %2477 = vmax.xlane.f32.xlu0 %v2476_v34  ;;  %v4592_v60 = vadd.f32 %v4330_v59, %v2093_v37 }
 0x438   : > { %v2096_v46 = vpop.f32.mrb[91].mxu1  ;;  %5208 = vst [vmem:[#allocation11_spill] sm:$0xff] %v4560_v13  ;;  %v4563_v17 = vadd.f32 %v3501_v45, %v4330_v59  ;;  %v4580_v31 = vsel %vm2382_vm3, %v4560_v13, -inf  ;;  %v2479_v45 = vsel %vm2415_vm4, %v4575_v20, -inf }
 0x439   : > { %2480 = vmax.xlane.f32.xlu1 %v2479_v45  ;;  %v2494_v51 = vsel %vm2415_vm4, %v4580_v31, -inf  ;;  %5210 = vst [vmem:[#allocation13_spill] sm:$0xff] %v4592_v60  ;;  %v4597_v13 = vadd.f32 %v4330_v59, %v2096_v46  ;;  %v4605_v6 = vsel %vm2382_vm3, %v4592_v60, -inf }
 0x43a   : > { %5209 = vst [vmem:[#allocation12_spill] sm:$0xff] %v4563_v17  ;;  %v4589_v53 = vsel %vm2382_vm3, %v4563_v17, -inf  ;;  %v2488_v37 = vsel %vm2415_vm4, %v4605_v6, -inf }
 0x43b   : > { %v2497_v34 = vsel %vm2415_vm4, %v4589_v53, -inf  ;;  %2495 = vmax.xlane.f32.xlu0 %v2494_v51  ;;  %5211 = vst [vmem:[#allocation14_spill] sm:$0xff] %v4597_v13  ;;  %v4615_v46 = vsel %vm2382_vm3, %v4597_v13, -inf }
 0x43c   : > { %v2491_v51 = vsel %vm2415_vm4, %v4615_v46, -inf }
 0x43d   : > { %v3504_v57 = vpop.f32.mrb[92].mxu1  ;;  %2498 = vmax.xlane.f32.xlu1 %v2497_v34 }
 0x43e   : > { %v2109_v1 = vpop.f32.mrb[93].mxu1  ;;  %v4610_v17 = vadd.f32 %v3504_v57, %v4330_v59 }
 0x43f   : > { %v3505_v12 = vpop.f32.mrb[94].mxu1  ;;  %v4600_v45 = vadd.f32 %v4330_v59, %v2109_v1  ;;  %2489 = vmax.xlane.f32.xlu0 %v2488_v37 }
 0x440   : > { %v2112_v29 = vpop.f32.mrb[95].mxu1  ;;  %5213 = vst [vmem:[#allocation16_spill] sm:$0xff] %v4610_v17  ;;  %v4628_v57 = vadd.f32 %v3505_v12, %v4330_v59 }
 0x441   : > { %5212 = vst [vmem:[#allocation15_spill] sm:$0xff] %v4600_v45  ;;  %v4618_v1 = vadd.f32 %v4330_v59, %v2112_v29  ;;  %v4625_v34 = vsel %vm2382_vm3, %v4600_v45, -inf  ;;  %2492 = vmax.xlane.f32.xlu1 %v2491_v51  ;;  %v4642_v45 = vsel %vm2382_vm3, %v4610_v17, -inf }
 0x442   : > { %5215 = vst [vmem:[#allocation18_spill] sm:$0xff] %v4628_v57  ;;  %v2500_v37 = vsel %vm2415_vm4, %v4625_v34, -inf  ;;  %v4647_v59 = vsel %vm2382_vm3, %v4628_v57, -inf  ;;  %v2506_v12 = vsel %vm2415_vm4, %v4642_v45, -inf }
 0x443   : > { %5214 = vst [vmem:[#allocation17_spill] sm:$0xff] %v4618_v1  ;;  %v4635_v29 = vsel %vm2382_vm3, %v4618_v1, -inf  ;;  %2501 = vmax.xlane.f32.xlu0 %v2500_v37  ;;  %v2509_v51 = vsel %vm2415_vm4, %v4647_v59, -inf }
 0x444   : > { %v2503_v13 = vsel %vm2415_vm4, %v4635_v29, -inf }
 0x445   : > { %2504 = vmax.xlane.f32.xlu1 %v2503_v13 }
 0x447   : > { %2507 = vmax.xlane.f32.xlu0 %v2506_v12 }
 0x449   : > { %2510 = vmax.xlane.f32.xlu1 %v2509_v51 }
 0x497   : > { %v2424_v37 = vpop.xlane.xlu1 %2423 }
 0x498   : > { %v2514_v1 = vsub.f32 %v4345_v2, %v2424_v37  ;;  %v2418_v60 = vpop.xlane.xlu0 %2417 }
 0x499   : > { %v2512_v17 = vsub.f32 %v4355_v5, %v2418_v60 }
 0x49a   : > { %v2548_v13 = vmul.f32 1.442695, %v2514_v1 }
 0x49b   : > { %v2544_v42 = vmul.f32 1.442695, %v2512_v17  ;;  %v2427_v55 = vpop.xlane.xlu1 %2426 }
 0x49c   : > { %3611 = vpow2.f32 %v2548_v13  ;;  %v2515_v57 = vsub.f32 %v4362_v8, %v2427_v55  ;;  %v2421_v58 = vpop.xlane.xlu0 %2420 }
 0x49d   : > { %v2513_v41 = vsub.f32 %v4367_v9, %v2421_v58  ;;  %3613 = vpow2.f32 %v2544_v42 }
 0x49e   : > { %v2550_v12 = vmul.f32 1.442695, %v2515_v57 }
 0x49f   : > { %v2546_v40 = vmul.f32 1.442695, %v2513_v41 }
 0x4a0   : > { %3615 = vpow2.f32 %v2550_v12  ;;  %v2436_v51 = vpop.xlane.xlu0 %2435 }
 0x4a1   : > { %v2518_v10 = vsub.f32 %v4385_v28, %v2436_v51  ;;  %v2439_v2 = vpop.xlane.xlu1 %2438  ;;  %3617 = vpow2.f32 %v2546_v40 }
 0x4a2   : > { %v2519_v5 = vsub.f32 %v4395_v21, %v2439_v2 }
 0x4a3   : > { %v2556_v60 = vmul.f32 1.442695, %v2518_v10 }
 0x4a4   : > { %v2558_v17 = vmul.f32 1.442695, %v2519_v5  ;;  %v2430_v1 = vpop.xlane.xlu0 %2429 }
 0x4a5   : > { %3619 = vpow2.f32 %v2556_v60  ;;  %v2516_v8 = vsub.f32 %v4402_v23, %v2430_v1  ;;  %v2433_v55 = vpop.xlane.xlu1 %2432 }
 0x4a6   : > { %v4660_v37 = vpop.eup %3611  ;;  %3621 = vpow2.f32 %v2558_v17  ;;  %v2517_v58 = vsub.f32 %v4407_v24, %v2433_v55 }
 0x4a7   : > { %v2552_v9 = vmul.f32 1.442695, %v2516_v8  ;;  %v2614_v28 = vsel %vm2415_vm4, %v4660_v37, 0.0  ;;  %v4665_v41 = vpop.eup %3613 }
 0x4a8   : > { %v2554_v40 = vmul.f32 1.442695, %v2517_v58  ;;  %2615 = vadd.xlane.f32.xlu0 %v2614_v28  ;;  %v2448_v21 = vpop.xlane.xlu0 %2447  ;;  %v2608_v24 = vsel %vm2415_vm4, %v4665_v41, 0.0 }
 0x4a9   : > { %3623 = vpow2.f32 %v2552_v9  ;;  %v2522_v23 = vsub.f32 %v4425_v35, %v2448_v21  ;;  %v2451_v42 = vpop.xlane.xlu1 %2450 }
 0x4aa   : > { %v4667_v10 = vpop.eup %3615  ;;  %3625 = vpow2.f32 %v2554_v40  ;;  %v2523_v51 = vsub.f32 %v4435_v38, %v2451_v42 }
 0x4ab   : > { %v2617_v57 = vsel %vm2415_vm4, %v4667_v10, 0.0  ;;  %v4674_v13 = vpop.eup %3617  ;;  %v2564_v12 = vmul.f32 1.442695, %v2522_v23 }
 0x4ac   : > { %2618 = vadd.xlane.f32.xlu1 %v2617_v57  ;;  %2609 = vadd.xlane.f32.xlu0 %v2608_v24  ;;  %v2442_v2 = vpop.xlane.xlu0 %2441  ;;  %v2566_v5 = vmul.f32 1.442695, %v2523_v51  ;;  %v2611_v1 = vsel %vm2415_vm4, %v4674_v13, 0.0 }
 0x4ad   : > { %3627 = vpow2.f32 %v2564_v12  ;;  %v2520_v60 = vsub.f32 %v4440_v39, %v2442_v2  ;;  %v2445_v17 = vpop.xlane.xlu1 %2444 }
 0x4ae   : > { %3629 = vpow2.f32 %v2566_v5  ;;  %v2521_v58 = vsub.f32 %v4447_v43, %v2445_v17 }
 0x4af   : > { %v4678_v35 = vpop.eup %3619  ;;  %v2560_v55 = vmul.f32 1.442695, %v2520_v60 }
 0x4b0   : > { %v4682_v8 = vpop.eup %3621  ;;  %2612 = vadd.xlane.f32.xlu1 %v2611_v1  ;;  %v2626_v38 = vsel %vm2415_vm4, %v4678_v35, 0.0  ;;  %v2562_v9 = vmul.f32 1.442695, %v2521_v58  ;;  %v2460_v39 = vpop.xlane.xlu0 %2459 }
 0x4b1   : > { %2627 = vadd.xlane.f32.xlu0 %v2626_v38  ;;  %3631 = vpow2.f32 %v2560_v55  ;;  %v2526_v40 = vsub.f32 %v4462_v50, %v2460_v39  ;;  %v2629_v21 = vsel %vm2415_vm4, %v4682_v8, 0.0  ;;  %v2463_v42 = vpop.xlane.xlu1 %2462 }
 0x4b2   : > { %3633 = vpow2.f32 %v2562_v9  ;;  %v2527_v24 = vsub.f32 %v4469_v52, %v2463_v42 }
 0x4b3   : > { %v4687_v28 = vpop.eup %3623  ;;  %v2572_v57 = vmul.f32 1.442695, %v2526_v40 }
 0x4b4   : > { %v4692_v23 = vpop.eup %3625  ;;  %2630 = vadd.xlane.f32.xlu1 %v2629_v21  ;;  %v2620_v43 = vsel %vm2415_vm4, %v4687_v28, 0.0  ;;  %v2574_v12 = vmul.f32 1.442695, %v2527_v24  ;;  %v2454_v60 = vpop.xlane.xlu0 %2453 }
 0x4b5   : > { %2621 = vadd.xlane.f32.xlu0 %v2620_v43  ;;  %3635 = vpow2.f32 %v2572_v57  ;;  %v2623_v50 = vsel %vm2415_vm4, %v4692_v23, 0.0  ;;  %v2524_v17 = vsub.f32 %v4482_v63, %v2454_v60  ;;  %v2457_v9 = vpop.xlane.xlu1 %2456 }
 0x4b6   : > { %3637 = vpow2.f32 %v2574_v12  ;;  %v2525_v39 = vsub.f32 %v4495_v18, %v2457_v9 }
 0x4b7   : > { %v4699_v51 = vpop.eup %3627  ;;  %v2568_v55 = vmul.f32 1.442695, %v2524_v17 }
 0x4b8   : > { %2624 = vadd.xlane.f32.xlu1 %v2623_v50  ;;  %v2638_v2 = vsel %vm2415_vm4, %v4699_v51, 0.0  ;;  %v4703_v5 = vpop.eup %3629  ;;  %v2472_v40 = vpop.xlane.xlu0 %2471  ;;  %v2570_v42 = vmul.f32 1.442695, %v2525_v39 }
 0x4b9   : > { %2639 = vadd.xlane.f32.xlu0 %v2638_v2  ;;  %v2641_v52 = vsel %vm2415_vm4, %v4703_v5, 0.0  ;;  %3639 = vpow2.f32 %v2568_v55  ;;  %v2530_v43 = vsub.f32 %v4505_v22, %v2472_v40  ;;  %v2475_v57 = vpop.xlane.xlu1 %2474 }
 0x4ba   : > { %3641 = vpow2.f32 %v2570_v42  ;;  %v2531_v18 = vsub.f32 %v4512_v27, %v2475_v57 }
 0x4bb   : > { %v4708_v1 = vpop.eup %3631  ;;  %v2580_v50 = vmul.f32 1.442695, %v2530_v43 }
 0x4bc   : > { %2642 = vadd.xlane.f32.xlu1 %v2641_v52  ;;  %v2632_v58 = vsel %vm2415_vm4, %v4708_v1, 0.0  ;;  %v4712_v38 = vpop.eup %3633  ;;  %v2466_v2 = vpop.xlane.xlu0 %2465  ;;  %v2582_v17 = vmul.f32 1.442695, %v2531_v18 }
 0x4bd   : > { %2633 = vadd.xlane.f32.xlu0 %v2632_v58  ;;  %v2635_v63 = vsel %vm2415_vm4, %v4712_v38, 0.0  ;;  %3643 = vpow2.f32 %v2580_v50  ;;  %v2528_v52 = vsub.f32 %v4519_v30, %v2466_v2  ;;  %v2469_v58 = vpop.xlane.xlu1 %2468 }
 0x4be   : > { %3645 = vpow2.f32 %v2582_v17  ;;  %v2529_v39 = vsub.f32 %v4535_v47, %v2469_v58 }
 0x4bf   : > { %v4717_v21 = vpop.eup %3635  ;;  %v2576_v22 = vmul.f32 1.442695, %v2528_v52 }
 0x4c0   : > { %2636 = vadd.xlane.f32.xlu1 %v2635_v63  ;;  %v2650_v24 = vsel %vm2415_vm4, %v4717_v21, 0.0  ;;  %v4722_v12 = vpop.eup %3637  ;;  %v2484_v9 = vpop.xlane.xlu0 %2483  ;;  %v2578_v42 = vmul.f32 1.442695, %v2529_v39 }
 0x4c1   : > { %2651 = vadd.xlane.f32.xlu0 %v2650_v24  ;;  %v2653_v60 = vsel %vm2415_vm4, %v4722_v12, 0.0  ;;  %3647 = vpow2.f32 %v2576_v22  ;;  %v2534_v63 = vsub.f32 %v4540_v49, %v2484_v9  ;;  %v2487_v43 = vpop.xlane.xlu1 %2486 }
 0x4c2   : > { %3649 = vpow2.f32 %v2578_v42  ;;  %v2535_v50 = vsub.f32 %v4552_v56, %v2487_v43 }
 0x4c3   : > { %v4728_v55 = vpop.eup %3639  ;;  %v2588_v30 = vmul.f32 1.442695, %v2534_v63 }
 0x4c4   : > { %2654 = vadd.xlane.f32.xlu1 %v2653_v60  ;;  %v2644_v27 = vsel %vm2415_vm4, %v4728_v55, 0.0  ;;  %v4734_v40 = vpop.eup %3641  ;;  %v2478_v18 = vpop.xlane.xlu0 %2477  ;;  %v2590_v2 = vmul.f32 1.442695, %v2535_v50 }
 0x4c5   : > { %2645 = vadd.xlane.f32.xlu0 %v2644_v27  ;;  %v2647_v57 = vsel %vm2415_vm4, %v4734_v40, 0.0  ;;  %3651 = vpow2.f32 %v2588_v30  ;;  %v2532_v60 = vsub.f32 %v4568_v25, %v2478_v18 }
 0x4c6   : > { %v2481_v17 = vpop.xlane.xlu1 %2480  ;;  %3653 = vpow2.f32 %v2590_v2 }
 0x4c7   : > { %v4738_v24 = vpop.eup %3643  ;;  %v2584_v56 = vmul.f32 1.442695, %v2532_v60  ;;  %v2533_v58 = vsub.f32 %v4575_v20, %v2481_v17 }
 0x4c8   : > { %2648 = vadd.xlane.f32.xlu1 %v2647_v57  ;;  %v2662_v47 = vsel %vm2415_vm4, %v4738_v24, 0.0  ;;  %v4743_v49 = vpop.eup %3645  ;;  %v2496_v9 = vpop.xlane.xlu0 %2495 }
 0x4c9   : > { %5216 = vst [vmem:[#allocation19_spill] sm:$0xff] %v4743_v49  ;;  %2663 = vadd.xlane.f32.xlu0 %v2662_v47  ;;  %v2665_v52 = vsel %vm2415_vm4, %v4743_v49, 0.0  ;;  %3655 = vpow2.f32 %v2584_v56  ;;  %v2586_v39 = vmul.f32 1.442695, %v2533_v58  ;;  %v2538_v25 = vsub.f32 %v4580_v31, %v2496_v9 }
 0x4ca   : > { %v2499_v63 = vpop.xlane.xlu1 %2498 }
 0x4cb   : > { %v4748_v22 = vpop.eup %3647  ;;  %3657 = vpow2.f32 %v2586_v39  ;;  %v2596_v42 = vmul.f32 1.442695, %v2538_v25  ;;  %v2539_v30 = vsub.f32 %v4589_v53, %v2499_v63 }
 0x4cc   : > { %5217 = vst [vmem:[#allocation20_spill] sm:$0xff] %v4748_v22  ;;  %2666 = vadd.xlane.f32.xlu1 %v2665_v52  ;;  %v2656_v27 = vsel %vm2415_vm4, %v4748_v22, 0.0  ;;  %v4755_v43 = vpop.eup %3649  ;;  %v2490_v20 = vpop.xlane.xlu0 %2489 }
 0x4cd   : > { %2657 = vadd.xlane.f32.xlu0 %v2656_v27  ;;  %5218 = vst [vmem:[#allocation21_spill] sm:$0xff] %v4755_v43  ;;  %3659 = vpow2.f32 %v2596_v42  ;;  %v2598_v57 = vmul.f32 1.442695, %v2539_v30  ;;  %v2536_v18 = vsub.f32 %v4605_v6, %v2490_v20  ;;  %v2659_v47 = vsel %vm2415_vm4, %v4755_v43, 0.0 }
 0x4ce   : > { %v2493_v31 = vpop.xlane.xlu1 %2492 }
 0x4cf   : > { %v4757_v50 = vpop.eup %3651  ;;  %3661 = vpow2.f32 %v2598_v57  ;;  %v2592_v60 = vmul.f32 1.442695, %v2536_v18  ;;  %v2537_v53 = vsub.f32 %v4615_v46, %v2493_v31 }
 0x4d0   : > { %5219 = vst [vmem:[#allocation22_spill] sm:$0xff] %v4757_v50  ;;  %2660 = vadd.xlane.f32.xlu1 %v2659_v47  ;;  %v2674_v2 = vsel %vm2415_vm4, %v4757_v50, 0.0  ;;  %v4765_v17 = vpop.eup %3653  ;;  %v2502_v52 = vpop.xlane.xlu0 %2501 }
 0x4d1   : > { %2675 = vadd.xlane.f32.xlu0 %v2674_v2  ;;  %5220 = vst [vmem:[#allocation23_spill] sm:$0xff] %v4765_v17  ;;  %3663 = vpow2.f32 %v2592_v60  ;;  %v2594_v56 = vmul.f32 1.442695, %v2537_v53  ;;  %v2540_v6 = vsub.f32 %v4625_v34, %v2502_v52  ;;  %v2677_v58 = vsel %vm2415_vm4, %v4765_v17, 0.0  ;;  %v5232_v17 = vld [vmem:[#allocation6_spill] sm:$0xff] }
 0x4d2   : > { %v2505_v27 = vpop.xlane.xlu1 %2504 }
 0x4d3   : > { %v4770_v9 = vpop.eup %3655  ;;  %3665 = vpow2.f32 %v2594_v56  ;;  %v2600_v39 = vmul.f32 1.442695, %v2540_v6  ;;  %v2541_v25 = vsub.f32 %v4635_v29, %v2505_v27 }
 0x4d4   : > { %5221 = vst [vmem:[#allocation24_spill] sm:$0xff] %v4770_v9  ;;  %2678 = vadd.xlane.f32.xlu1 %v2677_v58  ;;  %v2668_v46 = vsel %vm2415_vm4, %v4770_v9, 0.0  ;;  %v2508_v42 = vpop.xlane.xlu0 %2507 }
 0x4d5   : > { %v4775_v63 = vpop.eup %3657  ;;  %2669 = vadd.xlane.f32.xlu0 %v2668_v46  ;;  %3667 = vpow2.f32 %v2600_v39  ;;  %v2602_v34 = vmul.f32 1.442695, %v2541_v25  ;;  %v2542_v30 = vsub.f32 %v4642_v45, %v2508_v42 }
 0x4d6   : > { %5222 = vst [vmem:[#allocation25_spill] sm:$0xff] %v4775_v63  ;;  %v2671_v57 = vsel %vm2415_vm4, %v4775_v63, 0.0  ;;  %v2511_v18 = vpop.xlane.xlu1 %2510 }
 0x4d7   : > { %v4780_v20 = vpop.eup %3659  ;;  %3669 = vpow2.f32 %v2602_v34  ;;  %v2604_v29 = vmul.f32 1.442695, %v2542_v30  ;;  %v2543_v47 = vsub.f32 %v4647_v59, %v2511_v18  ;;  %v2128_v30 = vsub.f32 0.0, %v4334_v7 }
 0x4d8   : > { %5223 = vst [vmem:[#allocation26_spill] sm:$0xff] %v4780_v20  ;;  %2672 = vadd.xlane.f32.xlu1 %v2671_v57  ;;  %v2686_v31 = vsel %vm2415_vm4, %v4780_v20, 0.0  ;;  %v2126_v57 = vsub.f32 0.0, %v4337_v62  ;;  %v2129_v18 = vsub.f32 0.0, %v4340_v0 }
 0x4d9   : > { %v4785_v2 = vpop.eup %3661  ;;  %2687 = vadd.xlane.f32.xlu0 %v2686_v31  ;;  %3671 = vpow2.f32 %v2604_v29  ;;  %v2606_v60 = vmul.f32 1.442695, %v2543_v47  ;;  %v2127_v29 = vsub.f32 0.0, %v4348_v3  ;;  %v2162_v47 = vmul.f32 1.442695, %v2128_v30 }
 0x4da   : > { %5224 = vst [vmem:[#allocation27_spill] sm:$0xff] %v4785_v2  ;;  %v2689_v45 = vsel %vm2415_vm4, %v4785_v2, 0.0  ;;  %v2132_v31 = vsub.f32 0.0, %v4372_v11  ;;  %v2136_v30 = vsub.f32 0.0, %v4410_v26 }
 0x4db   : > { %v4789_v53 = vpop.eup %3663  ;;  %3673 = vpow2.f32 %v2606_v60  ;;  %v2158_v60 = vmul.f32 1.442695, %v2126_v57 }
 0x4dc   : > { %2690 = vadd.xlane.f32.xlu1 %v2689_v45  ;;  %5225 = vst [vmem:[#allocation28_spill] sm:$0xff] %v4789_v53  ;;  %v2680_v52 = vsel %vm2415_vm4, %v4789_v53, 0.0  ;;  %v2130_v45 = vsub.f32 0.0, %v4377_v14  ;;  %3675 = vpow2.f32 %v2162_v47  ;;  %v2135_v47 = vsub.f32 0.0, %v4428_v36 }
 0x4dd   : > { %v4793_v56 = vpop.eup %3665  ;;  %2681 = vadd.xlane.f32.xlu0 %v2680_v52  ;;  %v2164_v52 = vmul.f32 1.442695, %v2129_v18  ;;  %3677 = vpow2.f32 %v2158_v60  ;;  %v2137_v18 = vsub.f32 0.0, %v4420_v33 }
 0x4de   : > { %5226 = vst [vmem:[#allocation29_spill] sm:$0xff] %v4793_v56  ;;  %v2683_v59 = vsel %vm2415_vm4, %v4793_v56, 0.0 }
 0x4df   : > { %v4797_v6 = vpop.eup %3667  ;;  %3679 = vpow2.f32 %v2164_v52  ;;  %v2180_v52 = vmul.f32 1.442695, %v2137_v18  ;;  %v2138_v18 = vsub.f32 0.0, %v4472_v54 }
 0x4e0   : > { %5227 = vst [vmem:[#allocation30_spill] sm:$0xff] %v4797_v6  ;;  %2684 = vadd.xlane.f32.xlu1 %v2683_v59  ;;  %v2692_v58 = vsel %vm2415_vm4, %v4797_v6, 0.0  ;;  %v2133_v59 = vsub.f32 0.0, %v4380_v16 }
 0x4e1   : > { %v4801_v27 = vpop.eup %3669  ;;  %2693 = vadd.xlane.f32.xlu0 %v2692_v58  ;;  %v2160_v58 = vmul.f32 1.442695, %v2127_v29  ;;  %v2178_v29 = vmul.f32 1.442695, %v2136_v30 }
 0x4e2   : > { %5228 = vst [vmem:[#allocation31_spill] sm:$0xff] %v4801_v27  ;;  %v2695_v39 = vsel %vm2415_vm4, %v4801_v27, 0.0 }
 0x4e3   : > { %v4805_v25 = vpop.eup %3671  ;;  %3681 = vpow2.f32 %v2160_v58  ;;  %v2176_v58 = vmul.f32 1.442695, %v2135_v47 }
 0x4e4   : > { %5229 = vst [vmem:[#allocation32_spill] sm:$0xff] %v4805_v25  ;;  %2696 = vadd.xlane.f32.xlu1 %v2695_v39  ;;  %v2698_v46 = vsel %vm2415_vm4, %v4805_v25, 0.0  ;;  %v2170_v39 = vmul.f32 1.442695, %v2132_v31  ;;  %v2134_v25 = vsub.f32 0.0, %v4417_v32 }
 0x4e5   : > { %v4809_v42 = vpop.eup %3673  ;;  %2699 = vadd.xlane.f32.xlu0 %v2698_v46  ;;  %v2166_v46 = vmul.f32 1.442695, %v2130_v45 }
 0x4e6   : > { %5230 = vst [vmem:[#allocation33_spill] sm:$0xff] %v4809_v42  ;;  %v2701_v34 = vsel %vm2415_vm4, %v4809_v42, 0.0  ;;  %v2172_v42 = vmul.f32 1.442695, %v2133_v59  ;;  %3683 = vpow2.f32 %v2170_v39  ;;  %v2174_v31 = vmul.f32 1.442695, %v2134_v25  ;;  %v3676_v60 = vpop.eup %3675 }
 0x4e7   : > { %3685 = vpow2.f32 %v2166_v46  ;;  %v3678_v45 = vpop.eup %3677  ;;  %v2224_v27 = vadd.f32 1.0, %v3676_v60 }
 0x4e8   : > { %2702 = vadd.xlane.f32.xlu1 %v2701_v34  ;;  %v2131_v34 = vsub.f32 0.0, %v4388_v19  ;;  %3687 = vpow2.f32 %v2172_v42 }
 0x4e9   : > { %v3680_v59 = vpop.eup %3679 }
 0x4ea   : > { %v2168_v57 = vmul.f32 1.442695, %v2131_v34  ;;  %v2222_v34 = vadd.f32 1.0, %v3678_v45  ;;  %v2225_v42 = vadd.f32 1.0, %v3680_v59  ;;  %v2182_v59 = vmul.f32 1.442695, %v2138_v18 }
 0x4ec   : > { %3689 = vpow2.f32 %v2168_v57  ;;  %v2140_v57 = vsub.f32 0.0, %v4450_v44 }
 0x4ed   : > { %3691 = vpow2.f32 %v2178_v29  ;;  %v3682_v39 = vpop.eup %3681 }
 0x4ee   : > { %3693 = vpow2.f32 %v2174_v31  ;;  %v2223_v30 = vadd.f32 1.0, %v3682_v39  ;;  %v2141_v31 = vsub.f32 0.0, %v4455_v48  ;;  %v2186_v45 = vmul.f32 1.442695, %v2140_v57 }
 0x4ef   : > { %3695 = vpow2.f32 %v2180_v52  ;;  %v2139_v52 = vsub.f32 0.0, %v4477_v61 }
 0x4f0   : > { %v3684_v46 = vpop.eup %3683  ;;  %3697 = vpow2.f32 %v2176_v58 }
 0x4f1   : > { %v3686_v6 = vpop.eup %3685  ;;  %3699 = vrcp.f32 %v2224_v27  ;;  %v2228_v25 = vadd.f32 1.0, %v3684_v46  ;;  %v2188_v46 = vmul.f32 1.442695, %v2141_v31 }
 0x4f2   : > { %v3688_v56 = vpop.eup %3687  ;;  %3701 = vrcp.f32 %v2222_v34  ;;  %v2226_v29 = vadd.f32 1.0, %v3686_v6  ;;  %v2184_v34 = vmul.f32 1.442695, %v2139_v52  ;;  %v5231_v52 = vld [vmem:[#allocation4_spill] sm:$0xff] }
 0x4f3   : > { %3703 = vrcp.f32 %v2225_v42  ;;  %v2229_v60 = vadd.f32 1.0, %v3688_v56 }
 0x4f4   : > { %3705 = vrcp.f32 %v2223_v30  ;;  %v2144_v30 = vsub.f32 0.0, %v4487_v4 }
 0x4f5   : > { %3707 = vrcp.f32 %v2228_v25 }
 0x4f6   : > { %v3690_v47 = vpop.eup %3689  ;;  %3709 = vrcp.f32 %v2226_v29 }
 0x4f7   : > { %v3692_v58 = vpop.eup %3691  ;;  %v2227_v39 = vadd.f32 1.0, %v3690_v47  ;;  %3711 = vrcp.f32 %v2229_v60  ;;  %v2142_v60 = vsub.f32 0.0, %v4498_v15 }
 0x4f8   : > { %v3694_v27 = vpop.eup %3693  ;;  %3713 = vpow2.f32 %v2186_v45  ;;  %v2232_v53 = vadd.f32 1.0, %v3692_v58  ;;  %v2194_v45 = vmul.f32 1.442695, %v2144_v30 }
 0x4f9   : > { %v3696_v6 = vpop.eup %3695  ;;  %3715 = vpow2.f32 %v2182_v59  ;;  %v2230_v42 = vadd.f32 1.0, %v3694_v27  ;;  %v2145_v59 = vsub.f32 0.0, %v5231_v52  ;;  %v5233_v52 = vld [vmem:[#allocation7_spill] sm:$0xff] }
 0x4fa   : > { %v3698_v56 = vpop.eup %3697  ;;  %3717 = vrcp.f32 %v2227_v39  ;;  %v2233_v18 = vadd.f32 1.0, %v3696_v6 }
 0x4fb   : > { %v3700_v57 = vpop.eup %3699  ;;  %3719 = vpow2.f32 %v2188_v46  ;;  %v2231_v47 = vadd.f32 1.0, %v3698_v56  ;;  %v2190_v46 = vmul.f32 1.442695, %v2142_v60 }
 0x4fc   : > { %v3702_v25 = vpop.eup %3701  ;;  %3721 = vpow2.f32 %v2184_v34  ;;  %v2196_v34 = vmul.f32 1.442695, %v2145_v59  ;;  %v2320_v63 = vmul.f32 1.002, %v3700_v57 }
 0x4fd   : > { %v3704_v29 = vpop.eup %3703  ;;  %3723 = vrcp.f32 %v2232_v53  ;;  %v2318_v59 = vmul.f32 1.002, %v3702_v25 }
 0x4fe   : > { %v3706_v31 = vpop.eup %3705  ;;  %3725 = vrcp.f32 %v2230_v42  ;;  %v2321_v43 = vmul.f32 1.002, %v3704_v29 }
 0x4ff   : > { %v3708_v39 = vpop.eup %3707 }
 0x500   : > { %v3710_v27 = vpop.eup %3709 }
 0x501   : > { %v3712_v2 = vpop.eup %3711 }
 0x502   : > { %v3714_v6 = vpop.eup %3713 }
 0x503   : > { %v3716_v20 = vpop.eup %3715  ;;  %v2236_v9 = vadd.f32 1.0, %v3714_v6  ;;  %v2148_v6 = vsub.f32 0.0, %v5233_v52 }
 0x504   : > { %v3718_v42 = vpop.eup %3717  ;;  %v2234_v50 = vadd.f32 1.0, %v3716_v20 }
 0x505   : > { %v3720_v30 = vpop.eup %3719 }
 0x535   : > { %v2616_v58 = vpop.xlane.xlu0 %2615 }
 0x536   : > { %3727 = vrcp.f32 %v2616_v58  ;;  %v2143_v58 = vsub.f32 0.0, %v5232_v17  ;;  %v2237_v17 = vadd.f32 1.0, %v3720_v30  ;;  %v2325_v30 = vmul.f32 1.002, %v3712_v2 }
 0x537   : > { %3729 = vrcp.f32 %v2233_v18  ;;  %v3722_v18 = vpop.eup %3721 }
 0x538   : > { %3731 = vrcp.f32 %v2231_v47  ;;  %v3724_v60 = vpop.eup %3723  ;;  %v2192_v20 = vmul.f32 1.442695, %v2143_v58  ;;  %v2202_v58 = vmul.f32 1.442695, %v2148_v6 }
 0x539   : > { %3733 = vpow2.f32 %v2194_v45  ;;  %v2619_v53 = vpop.xlane.xlu1 %2618  ;;  %v2610_v56 = vpop.xlane.xlu0 %2609  ;;  %v3140_v45 = vadd.f32 -0.001, %v2320_v63  ;;  %v5235_v63 = vld [vmem:[#allocation9_spill] sm:$0xff] }
 0x53a   : > { %3735 = vrcp.f32 %v2619_v53  ;;  %v4833_v57 = vpop.eup %3725  ;;  %v2319_v53 = vmul.f32 1.002, %v3706_v31  ;;  %v2146_v25 = vsub.f32 0.0, %v5235_v63 }
 0x53b   : > { %3737 = vrcp.f32 %v2610_v56  ;;  %v2324_v56 = vmul.f32 1.002, %v3708_v39 }
 0x53c   : > { %3739 = vpow2.f32 %v2190_v46  ;;  %v3139_v52 = vadd.f32 -0.001, %v2319_v53  ;;  %v3145_v53 = vadd.f32 -0.001, %v2325_v30 }
 0x53d   : > { %3741 = vpow2.f32 %v2196_v34  ;;  %v2613_v47 = vpop.xlane.xlu1 %2612  ;;  %v5234_v34 = vld [vmem:[#allocation2_spill] sm:$0xff]  ;;  %v3144_v4 = vadd.f32 -0.001, %v2324_v56 }
 0x53e   : > { %3743 = vrcp.f32 %v2613_v47  ;;  %v2628_v15 = vpop.xlane.xlu0 %2627  ;;  %vm2769_vm5 = vcmp.lt.s32.totalorder %v5234_v34, 4  ;;  %vm2768_vm6 = vcmp.eq.s32.totalorder %v5234_v34, 0  ;;  %v3138_v47 = vadd.f32 -0.001, %v2318_v59 }
 0x53f   : > { %3745 = vrcp.f32 %v2628_v15  ;;  %v2322_v15 = vmul.f32 1.002, %v3710_v27 }
 0x540   : > { %v3728_v46 = vpop.eup %3727  ;;  %3747 = vrcp.f32 %v2236_v9 }
 0x541   : > { %v4838_v22 = vpop.eup %3729  ;;  %3749 = vrcp.f32 %v2234_v50  ;;  %v2738_v29 = vmul.f32 %v3728_v46, %v4660_v37  ;;  %v2631_v31 = vpop.xlane.xlu1 %2630  ;;  %v3141_v46 = vadd.f32 -0.001, %v2321_v43 }
 0x542   : > { %v4843_v39 = vpop.eup %3731  ;;  %3751 = vrcp.f32 %v2631_v31  ;;  %v2622_v9 = vpop.xlane.xlu0 %2621  ;;  %v2198_v31 = vmul.f32 1.442695, %v2146_v25 }
 0x543   : > { %v3734_v50 = vpop.eup %3733  ;;  %v2772_v63 = vsel %vm2769_vm5, %v3140_v45, %v2738_v29  ;;  %3753 = vrcp.f32 %v2622_v9  ;;  %v3142_v45 = vadd.f32 -0.001, %v2322_v15  ;;  %v2323_v29 = vmul.f32 1.002, %v3718_v42 }
 0x544   : > { %v3736_v37 = vpop.eup %3735  ;;  %3755 = vrcp.f32 %v2237_v17  ;;  %v2804_v27 = vsel %vm2768_vm6, %v4334_v7, %v2772_v63  ;;  %v2235_v9 = vadd.f32 1.0, %v3722_v18  ;;  %v5236_v63 = vld [vmem:[#allocation8_spill] sm:$0xff]  ;;  %v2328_v15 = vmul.f32 1.002, %v3724_v60 }
 0x545   : > { %v3738_v59 = vpop.eup %3737  ;;  %3757 = vpow2.f32 %v2192_v20  ;;  %2836 = vst.msk [vmem:[%s4848_s23 + $0x10] sm:$0xff] %vm2415_vm4, %v2804_v27  ;;  %v2739_v2 = vmul.f32 %v3736_v37, %v4667_v10  ;;  %v2625_v6 = vpop.xlane.xlu1 %2624  ;;  %v2149_v10 = vsub.f32 0.0, %v5236_v63 }
 0x546   : > { %v3740_v49 = vpop.eup %3739  ;;  %v2736_v43 = vmul.f32 %v3738_v59, %v4665_v41  ;;  %3759 = vrcp.f32 %v2625_v6  ;;  %v2640_v56 = vpop.xlane.xlu0 %2639  ;;  %v2326_v59 = vmul.f32 1.002, %v4833_v57  ;;  %v2329_v57 = vmul.f32 1.002, %v4838_v22 }
 0x547   : > { %v3742_v17 = vpop.eup %3741  ;;  %3761 = vpow2.f32 %v2202_v58  ;;  %v2773_v7 = vsel %vm2769_vm5, %v3141_v46, %v2739_v2  ;;  %v3143_v46 = vadd.f32 -0.001, %v2323_v29  ;;  %v2204_v6 = vmul.f32 1.442695, %v2149_v10 }
 0x548   : > { %v3744_v20 = vpop.eup %3743  ;;  %v2805_v42 = vsel %vm2768_vm6, %v4340_v0, %v2773_v7  ;;  %v2770_v41 = vsel %vm2769_vm5, %v3138_v47, %v2736_v43  ;;  %3763 = vrcp.f32 %v2640_v56  ;;  %v5237_v0 = vld [vmem:[#allocation10_spill] sm:$0xff]  ;;  %v3148_v7 = vadd.f32 -0.001, %v2328_v15 }
 0x549   : > { %v3746_v25 = vpop.eup %3745  ;;  %3765 = vpow2.f32 %v2198_v31  ;;  %2837 = vst.msk [vmem:[%s4848_s23 + $0x18] sm:$0xff] %vm2415_vm4, %v2805_v42  ;;  %v2802_v18 = vsel %vm2768_vm6, %v4337_v62, %v2770_v41  ;;  %v2737_v30 = vmul.f32 %v3744_v20, %v4674_v13  ;;  %v2643_v58 = vpop.xlane.xlu1 %2642  ;;  %v2147_v27 = vsub.f32 0.0, %v5237_v0 }
 0x54a   : > { %v4873_v37 = vpop.eup %3747  ;;  %2834 = vst.msk [vmem:[%s4848_s23] sm:$0xff] %vm2415_vm4, %v2802_v18  ;;  %v2742_v47 = vmul.f32 %v3746_v25, %v4678_v35  ;;  %3767 = vrcp.f32 %v2643_v58  ;;  %v2240_v62 = vadd.f32 1.0, %v3734_v50  ;;  %v2634_v31 = vpop.xlane.xlu0 %2633  ;;  %v2327_v42 = vmul.f32 1.002, %v4843_v39  ;;  %v5239_v25 = vld [vmem:[#allocation13_spill] sm:$0xff] }
 0x54b   : > { %v4879_v60 = vpop.eup %3749  ;;  %3769 = vrcp.f32 %v2235_v9  ;;  %v2771_v13 = vsel %vm2769_vm5, %v3139_v52, %v2737_v30  ;;  %v2200_v20 = vmul.f32 1.442695, %v2147_v27  ;;  %v2238_v41 = vadd.f32 1.0, %v3740_v49 }
 0x54c   : > { %v3752_v2 = vpop.eup %3751  ;;  %v2803_v29 = vsel %vm2768_vm6, %v4348_v3, %v2771_v13  ;;  %v2776_v35 = vsel %vm2769_vm5, %v3144_v4, %v2742_v47  ;;  %3771 = vrcp.f32 %v2634_v31  ;;  %v5238_v3 = vld [vmem:[#allocation11_spill] sm:$0xff]  ;;  %v2150_v15 = vsub.f32 0.0, %v5239_v25 }
 0x54d   : > { %v3754_v43 = vpop.eup %3753  ;;  %2835 = vst.msk [vmem:[%s4848_s23 + $0x8] sm:$0xff] %vm2415_vm4, %v2803_v29  ;;  %v2808_v52 = vsel %vm2768_vm6, %v4372_v11, %v2776_v35  ;;  %v2743_v50 = vmul.f32 %v3752_v2, %v4682_v8  ;;  %v2637_v9 = vpop.xlane.xlu1 %2636  ;;  %v2152_v10 = vsub.f32 0.0, %v5238_v3  ;;  %v2241_v39 = vadd.f32 1.0, %v3742_v17 }
 0x54e   : > { %v3756_v56 = vpop.eup %3755  ;;  %2840 = vst.msk [vmem:[%s4848_s23 + $0x30] sm:$0xff] %vm2415_vm4, %v2808_v52  ;;  %v2740_v4 = vmul.f32 %v3754_v43, %v4687_v28  ;;  %3773 = vrcp.f32 %v2637_v9  ;;  %v2652_v30 = vpop.xlane.xlu0 %2651  ;;  %v3146_v47 = vadd.f32 -0.001, %v2326_v59  ;;  %v3147_v43 = vadd.f32 -0.001, %v2327_v42 }
 0x54f   : > { %v3758_v22 = vpop.eup %3757  ;;  %3775 = vrcp.f32 %v2240_v62  ;;  %v2777_v11 = vsel %vm2769_vm5, %v3145_v53, %v2743_v50  ;;  %v3149_v62 = vadd.f32 -0.001, %v2329_v57  ;;  %v2332_v52 = vmul.f32 1.002, %v4873_v37  ;;  %v5241_v37 = vld [vmem:[#allocation14_spill] sm:$0xff] }
 0x550   : > { %v3760_v8 = vpop.eup %3759  ;;  %3777 = vpow2.f32 %v2204_v6  ;;  %v2809_v18 = vsel %vm2768_vm6, %v4380_v16, %v2777_v11  ;;  %v2774_v28 = vsel %vm2769_vm5, %v3142_v45, %v2740_v4  ;;  %v2210_v16 = vmul.f32 1.442695, %v2152_v10  ;;  %v5240_v6 = vld [vmem:[#allocation12_spill] sm:$0xff] }
 0x551   : > { %v3762_v58 = vpop.eup %3761  ;;  %2841 = vst.msk [vmem:[%s4848_s23 + $0x38] sm:$0xff] %vm2415_vm4, %v2809_v18  ;;  %v2806_v49 = vsel %vm2768_vm6, %v4377_v14, %v2774_v28  ;;  %v2741_v53 = vmul.f32 %v3760_v8, %v4692_v23  ;;  %3779 = vrcp.f32 %v2652_v30  ;;  %v2655_v45 = vpop.xlane.xlu1 %2654  ;;  %v2239_v17 = vadd.f32 1.0, %v3758_v22 }
 0x552   : > { %v3764_v27 = vpop.eup %3763  ;;  %3781 = vpow2.f32 %v2200_v20  ;;  %2838 = vst.msk [vmem:[%s4848_s23 + $0x20] sm:$0xff] %vm2415_vm4, %v2806_v49  ;;  %v2206_v23 = vmul.f32 1.442695, %v2150_v15  ;;  %v2153_v59 = vsub.f32 0.0, %v5240_v6  ;;  %v2244_v50 = vadd.f32 1.0, %v3762_v58 }
 0x553   : > { %v3766_v13 = vpop.eup %3765  ;;  %v2775_v31 = vsel %vm2769_vm5, %v3143_v46, %v2741_v53  ;;  %v2746_v2 = vmul.f32 %v3764_v27, %v4699_v51  ;;  %3783 = vrcp.f32 %v2655_v45  ;;  %v2151_v4 = vsub.f32 0.0, %v5241_v37  ;;  %v5242_v53 = vld [vmem:[#allocation15_spill] sm:$0xff] }
 0x554   : > { %v3768_v14 = vpop.eup %3767  ;;  %3785 = vrcp.f32 %v2238_v41  ;;  %v2807_v29 = vsel %vm2768_vm6, %v4388_v19, %v2775_v31  ;;  %v2242_v9 = vadd.f32 1.0, %v3766_v13  ;;  %v2212_v10 = vmul.f32 1.442695, %v2153_v59 }
 0x555   : > { %v4924_v35 = vpop.eup %3769  ;;  %3787 = vrcp.f32 %v2241_v39  ;;  %2839 = vst.msk [vmem:[%s4848_s23 + $0x28] sm:$0xff] %vm2415_vm4, %v2807_v29  ;;  %v2780_v51 = vsel %vm2769_vm5, %v3148_v7, %v2746_v2  ;;  %v2747_v46 = vmul.f32 %v3768_v14, %v4703_v5  ;;  %v2333_v41 = vmul.f32 1.002, %v3756_v56  ;;  %v2649_v39 = vpop.xlane.xlu1 %2648  ;;  %v5244_v2 = vld [vmem:[#allocation16_spill] sm:$0xff] }
 0x556   : > { %v3772_v57 = vpop.eup %3771  ;;  %3789 = vpow2.f32 %v2210_v16  ;;  %v2812_v19 = vsel %vm2768_vm6, %v4410_v26, %v2780_v51  ;;  %v2646_v26 = vpop.xlane.xlu0 %2645  ;;  %v2208_v30 = vmul.f32 1.442695, %v2151_v4  ;;  %v2154_v27 = vsub.f32 0.0, %v5242_v53  ;;  %v5243_v16 = vld [vmem:[#allocation17_spill] sm:$0xff] }
 0x557   : > { %3791 = vrcp.f32 %v2239_v17  ;;  %2844 = vst.msk [vmem:[%s4848_s23 + $0x50] sm:$0xff] %vm2415_vm4, %v2812_v19  ;;  %v2781_v20 = vsel %vm2769_vm5, %v3149_v62, %v2747_v46  ;;  %v2744_v7 = vmul.f32 %v3772_v57, %v4708_v1  ;;  %v2155_v45 = vsub.f32 0.0, %v5243_v16 }
 0x558   : > { %v3774_v5 = vpop.eup %3773  ;;  %3793 = vpow2.f32 %v2206_v23  ;;  %v2813_v22 = vsel %vm2768_vm6, %v4420_v33, %v2781_v20  ;;  %v3152_v33 = vadd.f32 -0.001, %v2332_v52  ;;  %v2330_v31 = vmul.f32 1.002, %v4879_v60 }
 0x559   : > { %v3776_v42 = vpop.eup %3775  ;;  %2845 = vst.msk [vmem:[%s4848_s23 + $0x58] sm:$0xff] %vm2415_vm4, %v2813_v22  ;;  %v2778_v11 = vsel %vm2769_vm5, %v3146_v47, %v2744_v7  ;;  %v2745_v1 = vmul.f32 %v3774_v5, %v4712_v38  ;;  %3795 = vrcp.f32 %v2646_v26  ;;  %v2156_v14 = vsub.f32 0.0, %v5244_v2  ;;  %v2667_v46 = vpop.xlane.xlu1 %2666 }
 0x55a   : > { %v3778_v8 = vpop.eup %3777  ;;  %3797 = vrcp.f32 %v2244_v50  ;;  %v2810_v15 = vsel %vm2768_vm6, %v4417_v32, %v2778_v11  ;;  %v3153_v32 = vadd.f32 -0.001, %v2333_v41  ;;  %v2664_v17 = vpop.xlane.xlu0 %2663  ;;  %v2214_v57 = vmul.f32 1.442695, %v2154_v27 }
 0x55b   : > { %v3780_v18 = vpop.eup %3779  ;;  %3799 = vrcp.f32 %v2242_v9  ;;  %2842 = vst.msk [vmem:[%s4848_s23 + $0x40] sm:$0xff] %vm2415_vm4, %v2810_v15  ;;  %v2779_v56 = vsel %vm2769_vm5, %v3147_v43, %v2745_v1  ;;  %v2245_v62 = vadd.f32 1.0, %v3778_v8  ;;  %v5245_v43 = vld [vmem:[#allocation18_spill] sm:$0xff]  ;;  %v2216_v50 = vmul.f32 1.442695, %v2155_v45 }
 0x55c   : > { %v3782_v28 = vpop.eup %3781  ;;  %3801 = vpow2.f32 %v2212_v10  ;;  %v2811_v38 = vsel %vm2768_vm6, %v4428_v36, %v2779_v56  ;;  %v2750_v58 = vmul.f32 %v3780_v18, %v4717_v21  ;;  %v2157_v51 = vsub.f32 0.0, %v5245_v43 }
 0x55d   : > { %v3784_v49 = vpop.eup %3783  ;;  %2843 = vst.msk [vmem:[%s4848_s23 + $0x48] sm:$0xff] %vm2415_vm4, %v2811_v38  ;;  %3803 = vrcp.f32 %v2649_v39  ;;  %v2243_v29 = vadd.f32 1.0, %v3782_v28  ;;  %v2331_v20 = vmul.f32 1.002, %v4924_v35  ;;  %v2218_v7 = vmul.f32 1.442695, %v2156_v14 }
 0x55e   : > { %v3786_v47 = vpop.eup %3785  ;;  %v2784_v13 = vsel %vm2769_vm5, %v3152_v33, %v2750_v58  ;;  %v2751_v36 = vmul.f32 %v3784_v49, %v4722_v12  ;;  %3805 = vrcp.f32 %v2664_v17  ;;  %v2658_v19 = vpop.xlane.xlu0 %2657  ;;  %v3150_v10 = vadd.f32 -0.001, %v2330_v31  ;;  %v5247_v17 = vld [vmem:[#allocation3_spill] sm:$0xff] }
 0x55f   : > { %v3788_v21 = vpop.eup %3787  ;;  %v2816_v23 = vsel %vm2768_vm6, %v4450_v44, %v2784_v13  ;;  %3807 = vpow2.f32 %v2208_v30  ;;  %v2220_v4 = vmul.f32 1.442695, %v2157_v51  ;;  %v2336_v26 = vmul.f32 1.002, %v3776_v42  ;;  %v2661_v42 = vpop.xlane.xlu1 %2660 }
 0x560   : > { %v3790_v59 = vpop.eup %3789  ;;  %2848 = vst.msk [vmem:[%s4848_s23 + $0x70] sm:$0xff] %vm2415_vm4, %v2816_v23  ;;  %v2785_v12 = vsel %vm2769_vm5, %v3153_v32, %v2751_v36  ;;  %3809 = vrcp.f32 %v2667_v46  ;;  %v3151_v35 = vadd.f32 -0.001, %v2331_v20  ;;  %v2337_v15 = vmul.f32 1.002, %v3788_v21  ;;  %v5248_v23 = vld [vmem:[#allocation20_spill] sm:$0xff] }
 0x561   : > { %v4977_v60 = vpop.eup %3791  ;;  %v2817_v44 = vsel %vm2768_vm6, %v4455_v48, %v2785_v12  ;;  %3811 = vrcp.f32 %v2245_v62  ;;  %v2248_v18 = vadd.f32 1.0, %v3790_v59  ;;  %v3156_v56 = vadd.f32 -0.001, %v2336_v26  ;;  %v5246_v62 = vld [vmem:[#allocation19_spill] sm:$0xff]  ;;  %v5249_v46 = vld [vmem:[#allocation4_spill] sm:$0xff] }
 0x562   : > { %v3794_v52 = vpop.eup %3793  ;;  %2849 = vst.msk [vmem:[%s4848_s23 + $0x78] sm:$0xff] %vm2415_vm4, %v2817_v44  ;;  %3813 = vrcp.f32 %v2658_v19  ;;  %v2334_v28 = vmul.f32 1.002, %v3786_v47  ;;  %v2676_v30 = vpop.xlane.xlu0 %2675  ;;  %v3157_v27 = vadd.f32 -0.001, %v2337_v15 }
 0x563   : > { %v3796_v9 = vpop.eup %3795  ;;  %3815 = vrcp.f32 %v2243_v29  ;;  %v2679_v13 = vpop.xlane.xlu1 %2678  ;;  %v2246_v31 = vadd.f32 1.0, %v3794_v52  ;;  %v2335_v12 = vmul.f32 1.002, %v4977_v60 }
 0x564   : > { %v3798_v5 = vpop.eup %3797  ;;  %v2748_v22 = vmul.f32 %v3796_v9, %v4728_v55  ;;  %3817 = vpow2.f32 %v2214_v57 }
 0x565   : > { %v4986_v48 = vpop.eup %3799  ;;  %3819 = vpow2.f32 %v2216_v50  ;;  %v2340_v20 = vmul.f32 1.002, %v3798_v5  ;;  %v5251_v5 = vld [vmem:[#allocation21_spill] sm:$0xff] }
 0x566   : > { %v3802_v41 = vpop.eup %3801  ;;  %v2782_v11 = vsel %vm2769_vm5, %v3150_v10, %v2748_v22  ;;  %3821 = vpow2.f32 %v2218_v7  ;;  %v2670_v29 = vpop.xlane.xlu0 %2669  ;;  %v5250_v7 = vld [vmem:[#allocation5_spill] sm:$0xff] }
 0x567   : > { %v3804_v1 = vpop.eup %3803  ;;  %v2814_v8 = vsel %vm2768_vm6, %v4472_v54, %v2782_v11  ;;  %3823 = vpow2.f32 %v2220_v4  ;;  %v2249_v58 = vadd.f32 1.0, %v3802_v41  ;;  %v2673_v19 = vpop.xlane.xlu1 %2672  ;;  %v3155_v41 = vadd.f32 -0.001, %v2335_v12 }
 0x568   : > { %2846 = vst.msk [vmem:[%s4848_s23 + $0x60] sm:$0xff] %vm2415_vm4, %v2814_v8  ;;  %v2749_v55 = vmul.f32 %v3804_v1, %v4734_v40  ;;  %v3806_v33 = vpop.eup %3805  ;;  %3825 = vrcp.f32 %v2661_v42 }
 0x569   : > { %v3808_v38 = vpop.eup %3807  ;;  %v2754_v54 = vmul.f32 %v3806_v33, %v4738_v24  ;;  %3827 = vrcp.f32 %v2676_v30  ;;  %v3154_v24 = vadd.f32 -0.001, %v2334_v28  ;;  %v5252_v33 = vld [vmem:[#allocation22_spill] sm:$0xff] }
 0x56a   : > { %v2783_v39 = vsel %vm2769_vm5, %v3151_v35, %v2749_v55  ;;  %v3810_v49 = vpop.eup %3809  ;;  %3829 = vrcp.f32 %v2248_v18  ;;  %v2247_v52 = vadd.f32 1.0, %v3808_v38  ;;  %v2688_v22 = vpop.xlane.xlu0 %2687  ;;  %v2338_v35 = vmul.f32 1.002, %v4986_v48 }
 0x56b   : > { %v2815_v40 = vsel %vm2768_vm6, %v4477_v61, %v2783_v39  ;;  %v3812_v32 = vpop.eup %3811  ;;  %v2788_v47 = vsel %vm2769_vm5, %v3156_v56, %v2754_v54  ;;  %v2755_v45 = vmul.f32 %v3810_v49, %v5246_v62  ;;  %3831 = vrcp.f32 %v2679_v13  ;;  %v2691_v18 = vpop.xlane.xlu1 %2690  ;;  %v5253_v39 = vld [vmem:[#allocation6_spill] sm:$0xff] }
 0x56c   : > { %2847 = vst.msk [vmem:[%s4848_s23 + $0x68] sm:$0xff] %vm2415_vm4, %v2815_v40  ;;  %v3814_v36 = vpop.eup %3813  ;;  %v2820_v21 = vsel %vm2768_vm6, %v5247_v17, %v2788_v47  ;;  %3833 = vrcp.f32 %v2249_v58  ;;  %v2341_v8 = vmul.f32 1.002, %v3812_v32  ;;  %v3160_v55 = vadd.f32 -0.001, %v2340_v20  ;;  %v5254_v47 = vld [vmem:[#allocation7_spill] sm:$0xff] }
 0x56d   : > { %v3816_v61 = vpop.eup %3815  ;;  %2852 = vst.msk [vmem:[%s4848_s23 + $0x90] sm:$0xff] %vm2415_vm4, %v2820_v21  ;;  %v2789_v14 = vsel %vm2769_vm5, %v3157_v27, %v2755_v45  ;;  %v2752_v59 = vmul.f32 %v3814_v36, %v5248_v23  ;;  %3835 = vrcp.f32 %v2670_v29  ;;  %v5255_v45 = vld [vmem:[#allocation23_spill] sm:$0xff] }
 0x56e   : > { %v3818_v51 = vpop.eup %3817  ;;  %v2821_v57 = vsel %vm2768_vm6, %v5249_v46, %v2789_v14  ;;  %3837 = vrcp.f32 %v2673_v19  ;;  %v2339_v30 = vmul.f32 1.002, %v3816_v61  ;;  %v2682_v40 = vpop.xlane.xlu0 %2681  ;;  %v3161_v27 = vadd.f32 -0.001, %v2341_v8  ;;  %v5258_v19 = vld [vmem:[#allocation9_spill] sm:$0xff] }
 0x56f   : > { %v3820_v44 = vpop.eup %3819  ;;  %2853 = vst.msk [vmem:[%s4848_s23 + $0x98] sm:$0xff] %vm2415_vm4, %v2821_v57  ;;  %v2786_v50 = vsel %vm2769_vm5, %v3154_v24, %v2752_v59  ;;  %3839 = vrcp.f32 %v2246_v31  ;;  %v2250_v4 = vadd.f32 1.0, %v3818_v51  ;;  %v3158_v24 = vadd.f32 -0.001, %v2338_v35  ;;  %v2685_v17 = vpop.xlane.xlu1 %2684  ;;  %v5256_v31 = vld [vmem:[#allocation24_spill] sm:$0xff] }
 0x570   : > { %v3822_v9 = vpop.eup %3821  ;;  %v2818_v10 = vsel %vm2768_vm6, %v5250_v7, %v2786_v50  ;;  %v2251_v11 = vadd.f32 1.0, %v3820_v44  ;;  %3841 = vrcp.f32 %v2688_v22  ;;  %v3159_v59 = vadd.f32 -0.001, %v2339_v30  ;;  %v5257_v44 = vld [vmem:[#allocation25_spill] sm:$0xff] }
 0x571   : > { %v3824_v60 = vpop.eup %3823  ;;  %2850 = vst.msk [vmem:[%s4848_s23 + $0x80] sm:$0xff] %vm2415_vm4, %v2818_v10  ;;  %3843 = vrcp.f32 %v2247_v52  ;;  %v2252_v42 = vadd.f32 1.0, %v3822_v9 }
 0x572   : > { %v3826_v26 = vpop.eup %3825  ;;  %3845 = vrcp.f32 %v2691_v18  ;;  %v2253_v48 = vadd.f32 1.0, %v3824_v60  ;;  %v2694_v51 = vpop.xlane.xlu0 %2693  ;;  %v5259_v60 = vld [vmem:[#allocation26_spill] sm:$0xff] }
 0x573   : > { %v3828_v1 = vpop.eup %3827  ;;  %v2753_v15 = vmul.f32 %v3826_v26, %v5251_v5  ;;  %3847 = vrcp.f32 %v2250_v4  ;;  %v2697_v20 = vpop.xlane.xlu1 %2696  ;;  %v5260_v5 = vld [vmem:[#allocation27_spill] sm:$0xff] }
 0x574   : > { %v2758_v56 = vmul.f32 %v3828_v1, %v5252_v33  ;;  %v3830_v28 = vpop.eup %3829  ;;  %3849 = vrcp.f32 %v2251_v11 }
 0x575   : > { %v2787_v38 = vsel %vm2769_vm5, %v3155_v41, %v2753_v15  ;;  %v3832_v58 = vpop.eup %3831  ;;  %3851 = vrcp.f32 %v2682_v40  ;;  %v2344_v21 = vmul.f32 1.002, %v3830_v28 }
 0x576   : > { %v2819_v54 = vsel %vm2768_vm6, %v5253_v39, %v2787_v38  ;;  %v2792_v49 = vsel %vm2769_vm5, %v3160_v55, %v2758_v56  ;;  %v3834_v32 = vpop.eup %3833  ;;  %v2759_v13 = vmul.f32 %v3832_v58, %v5255_v45  ;;  %3853 = vrcp.f32 %v2252_v42  ;;  %v2700_v11 = vpop.xlane.xlu0 %2699 }
 0x577   : > { %2851 = vst.msk [vmem:[%s4848_s23 + $0x88] sm:$0xff] %vm2415_vm4, %v2819_v54  ;;  %v2824_v62 = vsel %vm2768_vm6, %v5254_v47, %v2792_v49  ;;  %v3836_v36 = vpop.eup %3835  ;;  %3855 = vrcp.f32 %v2685_v17  ;;  %v2345_v46 = vmul.f32 1.002, %v3834_v32  ;;  %v2703_v33 = vpop.xlane.xlu1 %2702 }
 0x578   : > { %2856 = vst.msk [vmem:[%s4848_s23 + $0xb0] sm:$0xff] %vm2415_vm4, %v2824_v62  ;;  %v2793_v61 = vsel %vm2769_vm5, %v3161_v27, %v2759_v13  ;;  %v2756_v14 = vmul.f32 %v3836_v36, %v5256_v31  ;;  %v3838_v23 = vpop.eup %3837  ;;  %3857 = vrcp.f32 %v2253_v48  ;;  %v5261_v48 = vld [vmem:[#allocation28_spill] sm:$0xff]  ;;  %v5262_v27 = vld [vmem:[#allocation29_spill] sm:$0xff] }
 0x579   : > { %v2825_v29 = vsel %vm2768_vm6, %v5236_v63, %v2793_v61  ;;  %v3840_v12 = vpop.eup %3839  ;;  %v2757_v52 = vmul.f32 %v3838_v23, %v5257_v44  ;;  %3859 = vrcp.f32 %v2694_v51  ;;  %v3164_v63 = vadd.f32 -0.001, %v2344_v21  ;;  %v5264_v23 = vld [vmem:[#allocation31_spill] sm:$0xff] }
 0x57a   : > { %2857 = vst.msk [vmem:[%s4848_s23 + $0xb8] sm:$0xff] %vm2415_vm4, %v2825_v29  ;;  %v2790_v57 = vsel %vm2769_vm5, %v3158_v24, %v2756_v14  ;;  %v3842_v50 = vpop.eup %3841  ;;  %3861 = vrcp.f32 %v2697_v20  ;;  %v2342_v26 = vmul.f32 1.002, %v3840_v12  ;;  %v3165_v35 = vadd.f32 -0.001, %v2345_v46  ;;  %v5263_v24 = vld [vmem:[#allocation30_spill] sm:$0xff] }
 0x57b   : > { %v2822_v9 = vsel %vm2768_vm6, %v5258_v19, %v2790_v57  ;;  %v3844_v7 = vpop.eup %3843  ;;  %v2791_v10 = vsel %vm2769_vm5, %v3159_v59, %v2757_v52  ;;  %v2762_v4 = vmul.f32 %v3842_v50, %v5259_v60  ;;  %3863 = vrcp.f32 %v2700_v11  ;;  %v5265_v46 = vld [vmem:[#allocation32_spill] sm:$0xff] }
 0x57c   : > { %2854 = vst.msk [vmem:[%s4848_s23 + $0xa0] sm:$0xff] %vm2415_vm4, %v2822_v9  ;;  %v3846_v22 = vpop.eup %3845  ;;  %v2823_v41 = vsel %vm2768_vm6, %v5237_v0, %v2791_v10  ;;  %v2343_v55 = vmul.f32 1.002, %v3844_v7  ;;  %3865 = vrcp.f32 %v2703_v33  ;;  %v3162_v30 = vadd.f32 -0.001, %v2342_v26 }
 0x57d   : > { %v3848_v1 = vpop.eup %3847  ;;  %2855 = vst.msk [vmem:[%s4848_s23 + $0xa8] sm:$0xff] %vm2415_vm4, %v2823_v41  ;;  %v2796_v8 = vsel %vm2769_vm5, %v3164_v63, %v2762_v4  ;;  %v2763_v15 = vmul.f32 %v3846_v22, %v5260_v5 }
 0x57e   : > { %v3850_v18 = vpop.eup %3849  ;;  %v2828_v42 = vsel %vm2768_vm6, %v5238_v3, %v2796_v8  ;;  %v2346_v38 = vmul.f32 1.002, %v3848_v1  ;;  %v3163_v49 = vadd.f32 -0.001, %v2343_v55 }
 0x57f   : > { %v3852_v0 = vpop.eup %3851  ;;  %2860 = vst.msk [vmem:[%s4848_s23 + $0xd0] sm:$0xff] %vm2415_vm4, %v2828_v42  ;;  %v2797_v56 = vsel %vm2769_vm5, %v3165_v35, %v2763_v15  ;;  %v2347_v40 = vmul.f32 1.002, %v3850_v18 }
 0x580   : > { %v3854_v28 = vpop.eup %3853  ;;  %v2829_v58 = vsel %vm2768_vm6, %v5240_v6, %v2797_v56  ;;  %v2760_v39 = vmul.f32 %v3852_v0, %v5261_v48  ;;  %v3166_v13 = vadd.f32 -0.001, %v2346_v38 }
 0x581   : > { %v3856_v54 = vpop.eup %3855  ;;  %2861 = vst.msk [vmem:[%s4848_s23 + $0xd8] sm:$0xff] %vm2415_vm4, %v2829_v58  ;;  %v2348_v6 = vmul.f32 1.002, %v3854_v28  ;;  %v3167_v14 = vadd.f32 -0.001, %v2347_v40 }
 0x582   : > { %v3858_v3 = vpop.eup %3857  ;;  %v2794_v32 = vsel %vm2769_vm5, %v3162_v30, %v2760_v39  ;;  %v2761_v47 = vmul.f32 %v3856_v54, %v5262_v27 }
 0x583   : > { %v3860_v62 = vpop.eup %3859  ;;  %v2826_v45 = vsel %vm2768_vm6, %v5239_v25, %v2794_v32  ;;  %v2349_v31 = vmul.f32 1.002, %v3858_v3  ;;  %v3168_v12 = vadd.f32 -0.001, %v2348_v6 }
 0x584   : > { %2858 = vst.msk [vmem:[%s4848_s23 + $0xc0] sm:$0xff] %vm2415_vm4, %v2826_v45  ;;  %v2795_v36 = vsel %vm2769_vm5, %v3163_v49, %v2761_v47  ;;  %v2764_v17 = vmul.f32 %v3860_v62, %v5263_v24  ;;  %v3862_v21 = vpop.eup %3861 }
 0x585   : > { %v2827_v61 = vsel %vm2768_vm6, %v5241_v37, %v2795_v36  ;;  %v2765_v59 = vmul.f32 %v3862_v21, %v5264_v23  ;;  %v3864_v29 = vpop.eup %3863  ;;  %v3169_v50 = vadd.f32 -0.001, %v2349_v31 }
 0x586   : > { %2859 = vst.msk [vmem:[%s4848_s23 + $0xc8] sm:$0xff] %vm2415_vm4, %v2827_v61  ;;  %v2798_v25 = vsel %vm2769_vm5, %v3166_v13, %v2764_v17  ;;  %v2766_v57 = vmul.f32 %v3864_v29, %v5265_v46  ;;  %v3866_v44 = vpop.eup %3865 }
 0x587   : > { %v2830_v51 = vsel %vm2768_vm6, %v5242_v53, %v2798_v25  ;;  %v2799_v37 = vsel %vm2769_vm5, %v3167_v14, %v2765_v59  ;;  %v5266_v53 = vld [vmem:[#allocation33_spill] sm:$0xff] }
 0x588   : > { %2862 = vst.msk [vmem:[%s4848_s23 + $0xe0] sm:$0xff] %vm2415_vm4, %v2830_v51  ;;  %v2831_v52 = vsel %vm2768_vm6, %v5243_v16, %v2799_v37  ;;  %v2800_v19 = vsel %vm2769_vm5, %v3168_v12, %v2766_v57  ;;  %v2767_v9 = vmul.f32 %v3866_v44, %v5266_v53 }
 0x589   : > { %2863 = vst.msk [vmem:[%s4848_s23 + $0xe8] sm:$0xff] %vm2415_vm4, %v2831_v52  ;;  %v2832_v20 = vsel %vm2768_vm6, %v5244_v2, %v2800_v19 }
 0x58a   : > { %2864 = vst.msk [vmem:[%s4848_s23 + $0xf0] sm:$0xff] %vm2415_vm4, %v2832_v20  ;;  %v2801_v7 = vsel %vm2769_vm5, %v3169_v50, %v2767_v9 }
 0x58b   : > { %v2833_v16 = vsel %vm2768_vm6, %v5245_v43, %v2801_v7 }
 0x58c   : > { %2865 = vst.msk [vmem:[%s4848_s23 + $0xf8] sm:$0xff] %vm2415_vm4, %v2833_v16 }
 0x58d PF: > { %s19_s11 = sadd.s32 1, %s3889_s11   ;;  %s5267_s30 = smov %s3885_s10 }
 0x58e   : > { %p16_p5 = scmp.ge.s32.totalorder %s19_s11, 4   ;;  %s5268_s10 = smov %s5270_s12 }
 0x590   :  { %18 = sbr.rel (!%p16_p5) target bundleno = 2 (0x2), region = 88 }

</bundles_post_ra>
